<compile_context>
chip_gen: v5e
topology: v5e:2x2
jax: 0.10.0
libtpu: 0.0.40
codegen_flags: <defaults>
</compile_context>

<pallas_src>
import functools

import jax
import jax.numpy as jnp
from jax.experimental import pallas as pl
from jax.experimental.pallas import tpu as pltpu


# ---------------------------------------------------------------------------
# Fused forward kernel factory (fixed number of GIN layers / classes baked in)
# ---------------------------------------------------------------------------
def _make_fused_kernel(n_gin_layers, n_classes):
    n_layer_refs = 6 * n_gin_layers          # (w1', b1', w2', b2', s3, t3) per layer
    n_head_refs = n_gin_layers + 1           # one head weight per hidden rep

    def kernel(*refs):
        adj_ref, h0_ref = refs[0], refs[1]
        layer_refs = refs[2:2 + n_layer_refs]
        head_w_refs = refs[2 + n_layer_refs:2 + n_layer_refs + n_head_refs]
        pbias_ref = refs[2 + n_layer_refs + n_head_refs]
        o_ref = refs[-1]

        adj_hat = adj_ref[...]               # A + (1+eps) I  (folded host-side)

        def gin_layer(h, w1_ref, b1_ref, w2_ref, b2_ref, s3_ref, t3_ref):
            # sum aggregation + self term in one matmul
            pre = jnp.dot(adj_hat, h, preferred_element_type=jnp.float32)
            # MLP linear 1 (BN_mlp folded into w1'/b1') + relu
            z = jnp.maximum(
                jnp.dot(pre, w1_ref[...], preferred_element_type=jnp.float32)
                + b1_ref[...], 0.0)
            # MLP linear 2 (BN_apply folded into w2'/b2') + relu
            z = jnp.maximum(
                jnp.dot(z, w2_ref[...], preferred_element_type=jnp.float32)
                + b2_ref[...], 0.0)
            # outer Model.batch_norms[i] (cannot fold: relu in between) + relu
            return jnp.maximum(z * s3_ref[...] + t3_ref[...], 0.0)

        # hidden_rep[0] = h0, hidden_rep[i+1] = GIN layer i output (stays in VMEM/vregs)
        hidden = [h0_ref[...]]
        for l in range(n_gin_layers):
            hidden.append(gin_layer(hidden[-1], *layer_refs[6 * l:6 * l + 6]))

        # prediction heads: score[c] = sum_{n,d} h[n,d] * wp[c,n,d]
        # (== Linear_i(h.reshape(1,-1)) without bias); biases pre-summed host-side.
        c_iota = jax.lax.broadcasted_iota(jnp.int32, (1, n_classes), 1)
        score = pbias_ref[...]
        for h, wp_ref in zip(hidden, head_w_refs):
            for c in range(n_classes):
                s_c = jnp.sum(h * wp_ref[c])                 # scalar full reduce
                score = score + jnp.where(c_iota == c, s_c, 0.0)
        o_ref[...] = score

    return kernel


# ---------------------------------------------------------------------------
# Wrapper: one pallas_call, everything as whole-array VMEM operands (no grid)
# ---------------------------------------------------------------------------
def gin_model_forward(adj_hat, h0, layer_params, head_weights, head_bias_total):
    """layer_params: list of (w1', b1', w2', b2', s3, t3) per GIN layer.
    head_weights:   list of (C, N, D_i) arrays (one per hidden rep).
    head_bias_total: (1, C) sum of all prediction-head biases."""
    n_gin_layers = len(layer_params)
    n_classes = head_bias_total.shape[1]

    args = [adj_hat, h0]
    for lp in layer_params:
        args.extend(lp)
    args.extend(head_weights)
    args.append(head_bias_total)

    n_nodes, d_in = h0.shape
    n_hid = layer_params[0][0].shape[1]
    flops = (2 * n_nodes * n_nodes * d_in            # adj_hat @ h0
             + 2 * n_nodes * d_in * n_hid            # layer 0: @ W1'
             + 2 * n_nodes * n_hid * n_hid           # layer 0: @ W2'
             + 2 * n_nodes * n_nodes * n_hid         # layer 1: adj_hat @ h1
             + 4 * n_nodes * n_hid * n_hid           # layer 1: @ W1', @ W2'
             + 2 * n_nodes * d_in * n_classes        # head 0
             + 4 * n_nodes * n_hid * n_classes)      # heads 1, 2
    bytes_accessed = sum(int(a.size) * a.dtype.itemsize for a in args) + 4 * n_classes

    vmem_spec = pl.BlockSpec(memory_space=pltpu.MemorySpace.VMEM)
    return pl.pallas_call(
        _make_fused_kernel(n_gin_layers, n_classes),
        out_shape=jax.ShapeDtypeStruct((1, n_classes), jnp.float32),
        in_specs=[vmem_spec] * len(args),
        out_specs=vmem_spec,
        cost_estimate=pl.CostEstimate(flops=int(flops), transcendentals=0,
                                      bytes_accessed=int(bytes_accessed)),
    )(*args)


if __name__ == "__main__":
    jax.config.update("jax_default_matmul_precision", "highest")

    key = jax.random.PRNGKey(0)
    keys = iter(jax.random.split(key, 64))

    # model_config (small, consistent with the module)
    N = 16            # node_each_graph
    in_feats = 16     # must equal node_each_graph (Linear(N*N, C) head at layer 0)
    n_hidden = 32
    n_classes = 4
    n_layers = 3      # -> 2 GIN layers, 3 prediction heads
    eps_gin = 0.0     # GINConv init eps = 0, learn_eps = False
    # final_dropout: identity in eval mode; graph_pooling_type pool unused in forward.

    def linear_params(fan_in, fan_out):
        # PyTorch nn.Linear default init: U(-1/sqrt(fan_in), 1/sqrt(fan_in))
        bound = float(fan_in) ** -0.5
        w = jax.random.uniform(next(keys), (fan_in, fan_out), jnp.float32, -bound, bound)
        b = jax.random.uniform(next(keys), (1, fan_out), jnp.float32, -bound, bound)
        return w, b

    def bn_affine(dim, eps=1e-5):
        # eval-mode BatchNorm1d == per-feature affine: y = x*scale + shift
        gamma = jax.random.uniform(next(keys), (dim,), jnp.float32, 0.5, 1.5)
        beta = jax.random.uniform(next(keys), (dim,), jnp.float32, -0.5, 0.5)
        mean = jnp.zeros((dim,), jnp.float32)
        var = jnp.ones((dim,), jnp.float32)
        scale = gamma / jnp.sqrt(var + eps)
        shift = beta - mean * scale
        return scale[None, :], shift[None, :]

    # node features and adjacency (symmetric random graph, no self loops)
    h0 = jax.random.normal(next(keys), (N, in_feats), jnp.float32)
    a = (jax.random.uniform(next(keys), (N, N)) < 0.3).astype(jnp.float32)
    adj = jnp.maximum(a, a.T) * (1.0 - jnp.eye(N, dtype=jnp.float32))

    # raw (unfolded) parameters, matching the PyTorch module structure
    raw_gin_params = []
    for layer in range(n_layers - 1):
        d_in = in_feats if layer == 0 else n_hidden
        w1, b1 = linear_params(d_in, n_hidden)        # MLP.linears[0]
        s1, t1 = bn_affine(n_hidden)                  # MLP.batch_norms[0]
        w2, b2 = linear_params(n_hidden, n_hidden)    # MLP.linears[1]
        s2, t2 = bn_affine(n_hidden)                  # ApplyNodeFunc.bn
        s3, t3 = bn_affine(n_hidden)                  # Model.batch_norms[layer]
        raw_gin_params.append((w1, b1, s1, t1, w2, b2, s2, t2, s3, t3))

    raw_pred_params = []
    for layer in range(n_layers):
        fan_in = N * N if layer == 0 else N * n_hidden
        raw_pred_params.append(linear_params(fan_in, n_classes))

    # ------------- pure-JAX reference (PyTorch eval-mode semantics) -------------
    def reference_forward(adj_m, h_in):
        h = h_in
        hidden = [h_in]
        for (w1, b1, s1, t1, w2, b2, s2, t2, s3, t3) in raw_gin_params:
            pre = (1.0 + eps_gin) * h + adj_m @ h
            z = jnp.maximum((pre @ w1 + b1) * s1 + t1, 0.0)   # MLP lin1 + BN + relu
            z = z @ w2 + b2                                   # MLP lin2
            z = jnp.maximum(z * s2 + t2, 0.0)                 # ApplyNodeFunc BN + relu
            h = jnp.maximum(z * s3 + t3, 0.0)                 # Model BN + relu
            hidden.append(h)
        score = jnp.zeros((1, n_classes), jnp.float32)
        for i, hr in enumerate(hidden):
            w, b = raw_pred_params[i]
            score = score + (hr.reshape(1, -1) @ w + b)       # dropout = id (eval)
        return score

    # ------------- host-side constant folding for the fused kernel -------------
    fused_layer_params = []
    for (w1, b1, s1, t1, w2, b2, s2, t2, s3, t3) in raw_gin_params:
        fused_layer_params.append((w1 * s1, b1 * s1 + t1,     # BN_mlp folded
                                   w2 * s2, b2 * s2 + t2,     # BN_apply folded
                                   s3, t3))                   # outer BN kept

    adj_hat = adj + (1.0 + eps_gin) * jnp.eye(N, dtype=jnp.float32)

    head_dims = [in_feats] + [n_hidden] * (n_layers - 1)
    head_weights = [w.T.reshape(n_classes, N, d)
                    for (w, _), d in zip(raw_pred_params, head_dims)]
    head_bias_total = sum(b for _, b in raw_pred_params)      # (1, C)

    # ---------------------------- run fused kernel ----------------------------
    score = gin_model_forward(adj_hat, h0, fused_layer_params,
                              head_weights, head_bias_total)
    jax.block_until_ready(score)

    ref = reference_forward(adj, h0)
    if not bool(jnp.allclose(score, ref, rtol=2e-2, atol=2e-2)):
        raise AssertionError(f"Pallas kernel mismatch: {score} vs {ref}")

    print("KERNEL_OK")
</pallas_src>

<mosaic_0001>
module attributes {stable_mosaic.version = 11 : i64} {
  func.func @kernel(%arg0: memref<16x16xf32, #tpu.memory_space<vmem>>, %arg1: memref<16x16xf32, #tpu.memory_space<vmem>>, %arg2: memref<16x32xf32, #tpu.memory_space<vmem>>, %arg3: memref<1x32xf32, #tpu.memory_space<vmem>>, %arg4: memref<32x32xf32, #tpu.memory_space<vmem>>, %arg5: memref<1x32xf32, #tpu.memory_space<vmem>>, %arg6: memref<1x32xf32, #tpu.memory_space<vmem>>, %arg7: memref<1x32xf32, #tpu.memory_space<vmem>>, %arg8: memref<32x32xf32, #tpu.memory_space<vmem>>, %arg9: memref<1x32xf32, #tpu.memory_space<vmem>>, %arg10: memref<32x32xf32, #tpu.memory_space<vmem>>, %arg11: memref<1x32xf32, #tpu.memory_space<vmem>>, %arg12: memref<1x32xf32, #tpu.memory_space<vmem>>, %arg13: memref<1x32xf32, #tpu.memory_space<vmem>>, %arg14: memref<4x16x16xf32, #tpu.memory_space<vmem>>, %arg15: memref<4x16x32xf32, #tpu.memory_space<vmem>>, %arg16: memref<4x16x32xf32, #tpu.memory_space<vmem>>, %arg17: memref<1x4xf32, #tpu.memory_space<vmem>>, %arg18: memref<1x4xf32, #tpu.memory_space<vmem>>) attributes {dimension_semantics = [], scalar_prefetch = 0 : i64, scratch_operands = 0 : i64, tpu.core_type = #tpu.core_type<tc>} {
    %c0 = arith.constant 0 : index
    %c0_0 = arith.constant 0 : index
    %0 = vector.load %arg0[%c0, %c0_0] : memref<16x16xf32, #tpu.memory_space<vmem>>, vector<16x16xf32>
    %c0_1 = arith.constant 0 : index
    %c0_2 = arith.constant 0 : index
    %1 = vector.load %arg1[%c0_1, %c0_2] : memref<16x16xf32, #tpu.memory_space<vmem>>, vector<16x16xf32>
    %cst = arith.constant dense<0.000000e+00> : vector<16x16xf32>
    %2 = tpu.matmul %0, %1, %cst {dimension_numbers = #tpu.dot_dimension_numbers<[1], [0], [0], [1], [0, 0, 1, 1], [], []>, precision = #tpu.contract_precision<fp32>} : vector<16x16xf32>, vector<16x16xf32>, vector<16x16xf32> -> vector<16x16xf32>
    %c0_3 = arith.constant 0 : index
    %c0_4 = arith.constant 0 : index
    %3 = vector.load %arg2[%c0_3, %c0_4] : memref<16x32xf32, #tpu.memory_space<vmem>>, vector<16x32xf32>
    %cst_5 = arith.constant dense<0.000000e+00> : vector<16x32xf32>
    %4 = tpu.matmul %2, %3, %cst_5 {dimension_numbers = #tpu.dot_dimension_numbers<[1], [0], [0], [1], [0, 0, 1, 1], [], []>, precision = #tpu.contract_precision<fp32>} : vector<16x16xf32>, vector<16x32xf32>, vector<16x32xf32> -> vector<16x32xf32>
    %c0_6 = arith.constant 0 : index
    %c0_7 = arith.constant 0 : index
    %5 = vector.load %arg3[%c0_6, %c0_7] : memref<1x32xf32, #tpu.memory_space<vmem>>, vector<1x32xf32>
    %6 = vector.broadcast %5 : vector<1x32xf32> to vector<16x32xf32>
    %7 = arith.addf %4, %6 : vector<16x32xf32>
    %cst_8 = arith.constant 0.000000e+00 : f32
    %8 = vector.broadcast %cst_8 : f32 to vector<16x32xf32>
    %9 = arith.maximumf %7, %8 : vector<16x32xf32>
    %c0_9 = arith.constant 0 : index
    %c0_10 = arith.constant 0 : index
    %10 = vector.load %arg4[%c0_9, %c0_10] : memref<32x32xf32, #tpu.memory_space<vmem>>, vector<32x32xf32>
    %cst_11 = arith.constant dense<0.000000e+00> : vector<16x32xf32>
    %11 = tpu.matmul %9, %10, %cst_11 {dimension_numbers = #tpu.dot_dimension_numbers<[1], [0], [0], [1], [0, 0, 1, 1], [], []>, precision = #tpu.contract_precision<fp32>} : vector<16x32xf32>, vector<32x32xf32>, vector<16x32xf32> -> vector<16x32xf32>
    %c0_12 = arith.constant 0 : index
    %c0_13 = arith.constant 0 : index
    %12 = vector.load %arg5[%c0_12, %c0_13] : memref<1x32xf32, #tpu.memory_space<vmem>>, vector<1x32xf32>
    %13 = vector.broadcast %12 : vector<1x32xf32> to vector<16x32xf32>
    %14 = arith.addf %11, %13 : vector<16x32xf32>
    %cst_14 = arith.constant 0.000000e+00 : f32
    %15 = vector.broadcast %cst_14 : f32 to vector<16x32xf32>
    %16 = arith.maximumf %14, %15 : vector<16x32xf32>
    %c0_15 = arith.constant 0 : index
    %c0_16 = arith.constant 0 : index
    %17 = vector.load %arg6[%c0_15, %c0_16] : memref<1x32xf32, #tpu.memory_space<vmem>>, vector<1x32xf32>
    %18 = vector.broadcast %17 : vector<1x32xf32> to vector<16x32xf32>
    %19 = arith.mulf %16, %18 : vector<16x32xf32>
    %c0_17 = arith.constant 0 : index
    %c0_18 = arith.constant 0 : index
    %20 = vector.load %arg7[%c0_17, %c0_18] : memref<1x32xf32, #tpu.memory_space<vmem>>, vector<1x32xf32>
    %21 = vector.broadcast %20 : vector<1x32xf32> to vector<16x32xf32>
    %22 = arith.addf %19, %21 : vector<16x32xf32>
    %cst_19 = arith.constant 0.000000e+00 : f32
    %23 = vector.broadcast %cst_19 : f32 to vector<16x32xf32>
    %24 = arith.maximumf %22, %23 : vector<16x32xf32>
    %cst_20 = arith.constant dense<0.000000e+00> : vector<16x32xf32>
    %25 = tpu.matmul %0, %24, %cst_20 {dimension_numbers = #tpu.dot_dimension_numbers<[1], [0], [0], [1], [0, 0, 1, 1], [], []>, precision = #tpu.contract_precision<fp32>} : vector<16x16xf32>, vector<16x32xf32>, vector<16x32xf32> -> vector<16x32xf32>
    %c0_21 = arith.constant 0 : index
    %c0_22 = arith.constant 0 : index
    %26 = vector.load %arg8[%c0_21, %c0_22] : memref<32x32xf32, #tpu.memory_space<vmem>>, vector<32x32xf32>
    %cst_23 = arith.constant dense<0.000000e+00> : vector<16x32xf32>
    %27 = tpu.matmul %25, %26, %cst_23 {dimension_numbers = #tpu.dot_dimension_numbers<[1], [0], [0], [1], [0, 0, 1, 1], [], []>, precision = #tpu.contract_precision<fp32>} : vector<16x32xf32>, vector<32x32xf32>, vector<16x32xf32> -> vector<16x32xf32>
    %c0_24 = arith.constant 0 : index
    %c0_25 = arith.constant 0 : index
    %28 = vector.load %arg9[%c0_24, %c0_25] : memref<1x32xf32, #tpu.memory_space<vmem>>, vector<1x32xf32>
    %29 = vector.broadcast %28 : vector<1x32xf32> to vector<16x32xf32>
    %30 = arith.addf %27, %29 : vector<16x32xf32>
    %cst_26 = arith.constant 0.000000e+00 : f32
    %31 = vector.broadcast %cst_26 : f32 to vector<16x32xf32>
    %32 = arith.maximumf %30, %31 : vector<16x32xf32>
    %c0_27 = arith.constant 0 : index
    %c0_28 = arith.constant 0 : index
    %33 = vector.load %arg10[%c0_27, %c0_28] : memref<32x32xf32, #tpu.memory_space<vmem>>, vector<32x32xf32>
    %cst_29 = arith.constant dense<0.000000e+00> : vector<16x32xf32>
    %34 = tpu.matmul %32, %33, %cst_29 {dimension_numbers = #tpu.dot_dimension_numbers<[1], [0], [0], [1], [0, 0, 1, 1], [], []>, precision = #tpu.contract_precision<fp32>} : vector<16x32xf32>, vector<32x32xf32>, vector<16x32xf32> -> vector<16x32xf32>
    %c0_30 = arith.constant 0 : index
    %c0_31 = arith.constant 0 : index
    %35 = vector.load %arg11[%c0_30, %c0_31] : memref<1x32xf32, #tpu.memory_space<vmem>>, vector<1x32xf32>
    %36 = vector.broadcast %35 : vector<1x32xf32> to vector<16x32xf32>
    %37 = arith.addf %34, %36 : vector<16x32xf32>
    %cst_32 = arith.constant 0.000000e+00 : f32
    %38 = vector.broadcast %cst_32 : f32 to vector<16x32xf32>
    %39 = arith.maximumf %37, %38 : vector<16x32xf32>
    %c0_33 = arith.constant 0 : index
    %c0_34 = arith.constant 0 : index
    %40 = vector.load %arg12[%c0_33, %c0_34] : memref<1x32xf32, #tpu.memory_space<vmem>>, vector<1x32xf32>
    %41 = vector.broadcast %40 : vector<1x32xf32> to vector<16x32xf32>
    %42 = arith.mulf %39, %41 : vector<16x32xf32>
    %c0_35 = arith.constant 0 : index
    %c0_36 = arith.constant 0 : index
    %43 = vector.load %arg13[%c0_35, %c0_36] : memref<1x32xf32, #tpu.memory_space<vmem>>, vector<1x32xf32>
    %44 = vector.broadcast %43 : vector<1x32xf32> to vector<16x32xf32>
    %45 = arith.addf %42, %44 : vector<16x32xf32>
    %cst_37 = arith.constant 0.000000e+00 : f32
    %46 = vector.broadcast %cst_37 : f32 to vector<16x32xf32>
    %47 = arith.maximumf %45, %46 : vector<16x32xf32>
    %48 = tpu.iota {dimensions = array<i32: 1>} : vector<1x4xi32>
    %c0_38 = arith.constant 0 : index
    %c0_39 = arith.constant 0 : index
    %49 = vector.load %arg17[%c0_38, %c0_39] : memref<1x4xf32, #tpu.memory_space<vmem>>, vector<1x4xf32>
    %c0_40 = arith.constant 0 : index
    %c0_41 = arith.constant 0 : index
    %c0_42 = arith.constant 0 : index
    %50 = vector.load %arg14[%c0_40, %c0_41, %c0_42] : memref<4x16x16xf32, #tpu.memory_space<vmem>>, vector<1x16x16xf32>
    %51 = vector.shape_cast %50 : vector<1x16x16xf32> to vector<16x16xf32>
    %52 = arith.mulf %1, %51 : vector<16x16xf32>
    %53 = vector.shape_cast %52 : vector<16x16xf32> to vector<1x16x16xf32>
    %cst_43 = arith.constant dense<0.000000e+00> : vector<1xf32>
    %54 = vector.multi_reduction <add>, %53, %cst_43 [1, 2] : vector<1x16x16xf32> to vector<1xf32>
    %55 = vector.shape_cast %54 : vector<1xf32> to vector<1x1x1xf32>
    %56 = vector.extract %55[0, 0, 0] : f32 from vector<1x1x1xf32>
    %c0_i32 = arith.constant 0 : i32
    %57 = vector.broadcast %c0_i32 : i32 to vector<1x4xi32>
    %58 = arith.cmpi eq, %48, %57 : vector<1x4xi32>
    %cst_44 = arith.constant 0.000000e+00 : f32
    %59 = vector.broadcast %56 : f32 to vector<1x4xf32>
    %60 = vector.broadcast %cst_44 : f32 to vector<1x4xf32>
    %61 = arith.select %58, %59, %60 : vector<1x4xi1>, vector<1x4xf32>
    %62 = arith.addf %49, %61 : vector<1x4xf32>
    %c1 = arith.constant 1 : index
    %c0_45 = arith.constant 0 : index
    %c0_46 = arith.constant 0 : index
    %63 = vector.load %arg14[%c1, %c0_45, %c0_46] : memref<4x16x16xf32, #tpu.memory_space<vmem>>, vector<1x16x16xf32>
    %64 = vector.shape_cast %63 : vector<1x16x16xf32> to vector<16x16xf32>
    %65 = arith.mulf %1, %64 : vector<16x16xf32>
    %66 = vector.shape_cast %65 : vector<16x16xf32> to vector<1x16x16xf32>
    %cst_47 = arith.constant dense<0.000000e+00> : vector<1xf32>
    %67 = vector.multi_reduction <add>, %66, %cst_47 [1, 2] : vector<1x16x16xf32> to vector<1xf32>
    %68 = vector.shape_cast %67 : vector<1xf32> to vector<1x1x1xf32>
    %69 = vector.extract %68[0, 0, 0] : f32 from vector<1x1x1xf32>
    %c1_i32 = arith.constant 1 : i32
    %70 = vector.broadcast %c1_i32 : i32 to vector<1x4xi32>
    %71 = arith.cmpi eq, %48, %70 : vector<1x4xi32>
    %cst_48 = arith.constant 0.000000e+00 : f32
    %72 = vector.broadcast %69 : f32 to vector<1x4xf32>
    %73 = vector.broadcast %cst_48 : f32 to vector<1x4xf32>
    %74 = arith.select %71, %72, %73 : vector<1x4xi1>, vector<1x4xf32>
    %75 = arith.addf %62, %74 : vector<1x4xf32>
    %c2 = arith.constant 2 : index
    %c0_49 = arith.constant 0 : index
    %c0_50 = arith.constant 0 : index
    %76 = vector.load %arg14[%c2, %c0_49, %c0_50] : memref<4x16x16xf32, #tpu.memory_space<vmem>>, vector<1x16x16xf32>
    %77 = vector.shape_cast %76 : vector<1x16x16xf32> to vector<16x16xf32>
    %78 = arith.mulf %1, %77 : vector<16x16xf32>
    %79 = vector.shape_cast %78 : vector<16x16xf32> to vector<1x16x16xf32>
    %cst_51 = arith.constant dense<0.000000e+00> : vector<1xf32>
    %80 = vector.multi_reduction <add>, %79, %cst_51 [1, 2] : vector<1x16x16xf32> to vector<1xf32>
    %81 = vector.shape_cast %80 : vector<1xf32> to vector<1x1x1xf32>
    %82 = vector.extract %81[0, 0, 0] : f32 from vector<1x1x1xf32>
    %c2_i32 = arith.constant 2 : i32
    %83 = vector.broadcast %c2_i32 : i32 to vector<1x4xi32>
    %84 = arith.cmpi eq, %48, %83 : vector<1x4xi32>
    %cst_52 = arith.constant 0.000000e+00 : f32
    %85 = vector.broadcast %82 : f32 to vector<1x4xf32>
    %86 = vector.broadcast %cst_52 : f32 to vector<1x4xf32>
    %87 = arith.select %84, %85, %86 : vector<1x4xi1>, vector<1x4xf32>
    %88 = arith.addf %75, %87 : vector<1x4xf32>
    %c3 = arith.constant 3 : index
    %c0_53 = arith.constant 0 : index
    %c0_54 = arith.constant 0 : index
    %89 = vector.load %arg14[%c3, %c0_53, %c0_54] : memref<4x16x16xf32, #tpu.memory_space<vmem>>, vector<1x16x16xf32>
    %90 = vector.shape_cast %89 : vector<1x16x16xf32> to vector<16x16xf32>
    %91 = arith.mulf %1, %90 : vector<16x16xf32>
    %92 = vector.shape_cast %91 : vector<16x16xf32> to vector<1x16x16xf32>
    %cst_55 = arith.constant dense<0.000000e+00> : vector<1xf32>
    %93 = vector.multi_reduction <add>, %92, %cst_55 [1, 2] : vector<1x16x16xf32> to vector<1xf32>
    %94 = vector.shape_cast %93 : vector<1xf32> to vector<1x1x1xf32>
    %95 = vector.extract %94[0, 0, 0] : f32 from vector<1x1x1xf32>
    %c3_i32 = arith.constant 3 : i32
    %96 = vector.broadcast %c3_i32 : i32 to vector<1x4xi32>
    %97 = arith.cmpi eq, %48, %96 : vector<1x4xi32>
    %cst_56 = arith.constant 0.000000e+00 : f32
    %98 = vector.broadcast %95 : f32 to vector<1x4xf32>
    %99 = vector.broadcast %cst_56 : f32 to vector<1x4xf32>
    %100 = arith.select %97, %98, %99 : vector<1x4xi1>, vector<1x4xf32>
    %101 = arith.addf %88, %100 : vector<1x4xf32>
    %c0_57 = arith.constant 0 : index
    %c0_58 = arith.constant 0 : index
    %c0_59 = arith.constant 0 : index
    %102 = vector.load %arg15[%c0_57, %c0_58, %c0_59] : memref<4x16x32xf32, #tpu.memory_space<vmem>>, vector<1x16x32xf32>
    %103 = vector.shape_cast %102 : vector<1x16x32xf32> to vector<16x32xf32>
    %104 = arith.mulf %24, %103 : vector<16x32xf32>
    %105 = vector.shape_cast %104 : vector<16x32xf32> to vector<1x16x32xf32>
    %cst_60 = arith.constant dense<0.000000e+00> : vector<1xf32>
    %106 = vector.multi_reduction <add>, %105, %cst_60 [1, 2] : vector<1x16x32xf32> to vector<1xf32>
    %107 = vector.shape_cast %106 : vector<1xf32> to vector<1x1x1xf32>
    %108 = vector.extract %107[0, 0, 0] : f32 from vector<1x1x1xf32>
    %c0_i32_61 = arith.constant 0 : i32
    %109 = vector.broadcast %c0_i32_61 : i32 to vector<1x4xi32>
    %110 = arith.cmpi eq, %48, %109 : vector<1x4xi32>
    %cst_62 = arith.constant 0.000000e+00 : f32
    %111 = vector.broadcast %108 : f32 to vector<1x4xf32>
    %112 = vector.broadcast %cst_62 : f32 to vector<1x4xf32>
    %113 = arith.select %110, %111, %112 : vector<1x4xi1>, vector<1x4xf32>
    %114 = arith.addf %101, %113 : vector<1x4xf32>
    %c1_63 = arith.constant 1 : index
    %c0_64 = arith.constant 0 : index
    %c0_65 = arith.constant 0 : index
    %115 = vector.load %arg15[%c1_63, %c0_64, %c0_65] : memref<4x16x32xf32, #tpu.memory_space<vmem>>, vector<1x16x32xf32>
    %116 = vector.shape_cast %115 : vector<1x16x32xf32> to vector<16x32xf32>
    %117 = arith.mulf %24, %116 : vector<16x32xf32>
    %118 = vector.shape_cast %117 : vector<16x32xf32> to vector<1x16x32xf32>
    %cst_66 = arith.constant dense<0.000000e+00> : vector<1xf32>
    %119 = vector.multi_reduction <add>, %118, %cst_66 [1, 2] : vector<1x16x32xf32> to vector<1xf32>
    %120 = vector.shape_cast %119 : vector<1xf32> to vector<1x1x1xf32>
    %121 = vector.extract %120[0, 0, 0] : f32 from vector<1x1x1xf32>
    %c1_i32_67 = arith.constant 1 : i32
    %122 = vector.broadcast %c1_i32_67 : i32 to vector<1x4xi32>
    %123 = arith.cmpi eq, %48, %122 : vector<1x4xi32>
    %cst_68 = arith.constant 0.000000e+00 : f32
    %124 = vector.broadcast %121 : f32 to vector<1x4xf32>
    %125 = vector.broadcast %cst_68 : f32 to vector<1x4xf32>
    %126 = arith.select %123, %124, %125 : vector<1x4xi1>, vector<1x4xf32>
    %127 = arith.addf %114, %126 : vector<1x4xf32>
    %c2_69 = arith.constant 2 : index
    %c0_70 = arith.constant 0 : index
    %c0_71 = arith.constant 0 : index
    %128 = vector.load %arg15[%c2_69, %c0_70, %c0_71] : memref<4x16x32xf32, #tpu.memory_space<vmem>>, vector<1x16x32xf32>
    %129 = vector.shape_cast %128 : vector<1x16x32xf32> to vector<16x32xf32>
    %130 = arith.mulf %24, %129 : vector<16x32xf32>
    %131 = vector.shape_cast %130 : vector<16x32xf32> to vector<1x16x32xf32>
    %cst_72 = arith.constant dense<0.000000e+00> : vector<1xf32>
    %132 = vector.multi_reduction <add>, %131, %cst_72 [1, 2] : vector<1x16x32xf32> to vector<1xf32>
    %133 = vector.shape_cast %132 : vector<1xf32> to vector<1x1x1xf32>
    %134 = vector.extract %133[0, 0, 0] : f32 from vector<1x1x1xf32>
    %c2_i32_73 = arith.constant 2 : i32
    %135 = vector.broadcast %c2_i32_73 : i32 to vector<1x4xi32>
    %136 = arith.cmpi eq, %48, %135 : vector<1x4xi32>
    %cst_74 = arith.constant 0.000000e+00 : f32
    %137 = vector.broadcast %134 : f32 to vector<1x4xf32>
    %138 = vector.broadcast %cst_74 : f32 to vector<1x4xf32>
    %139 = arith.select %136, %137, %138 : vector<1x4xi1>, vector<1x4xf32>
    %140 = arith.addf %127, %139 : vector<1x4xf32>
    %c3_75 = arith.constant 3 : index
    %c0_76 = arith.constant 0 : index
    %c0_77 = arith.constant 0 : index
    %141 = vector.load %arg15[%c3_75, %c0_76, %c0_77] : memref<4x16x32xf32, #tpu.memory_space<vmem>>, vector<1x16x32xf32>
    %142 = vector.shape_cast %141 : vector<1x16x32xf32> to vector<16x32xf32>
    %143 = arith.mulf %24, %142 : vector<16x32xf32>
    %144 = vector.shape_cast %143 : vector<16x32xf32> to vector<1x16x32xf32>
    %cst_78 = arith.constant dense<0.000000e+00> : vector<1xf32>
    %145 = vector.multi_reduction <add>, %144, %cst_78 [1, 2] : vector<1x16x32xf32> to vector<1xf32>
    %146 = vector.shape_cast %145 : vector<1xf32> to vector<1x1x1xf32>
    %147 = vector.extract %146[0, 0, 0] : f32 from vector<1x1x1xf32>
    %c3_i32_79 = arith.constant 3 : i32
    %148 = vector.broadcast %c3_i32_79 : i32 to vector<1x4xi32>
    %149 = arith.cmpi eq, %48, %148 : vector<1x4xi32>
    %cst_80 = arith.constant 0.000000e+00 : f32
    %150 = vector.broadcast %147 : f32 to vector<1x4xf32>
    %151 = vector.broadcast %cst_80 : f32 to vector<1x4xf32>
    %152 = arith.select %149, %150, %151 : vector<1x4xi1>, vector<1x4xf32>
    %153 = arith.addf %140, %152 : vector<1x4xf32>
    %c0_81 = arith.constant 0 : index
    %c0_82 = arith.constant 0 : index
    %c0_83 = arith.constant 0 : index
    %154 = vector.load %arg16[%c0_81, %c0_82, %c0_83] : memref<4x16x32xf32, #tpu.memory_space<vmem>>, vector<1x16x32xf32>
    %155 = vector.shape_cast %154 : vector<1x16x32xf32> to vector<16x32xf32>
    %156 = arith.mulf %47, %155 : vector<16x32xf32>
    %157 = vector.shape_cast %156 : vector<16x32xf32> to vector<1x16x32xf32>
    %cst_84 = arith.constant dense<0.000000e+00> : vector<1xf32>
    %158 = vector.multi_reduction <add>, %157, %cst_84 [1, 2] : vector<1x16x32xf32> to vector<1xf32>
    %159 = vector.shape_cast %158 : vector<1xf32> to vector<1x1x1xf32>
    %160 = vector.extract %159[0, 0, 0] : f32 from vector<1x1x1xf32>
    %c0_i32_85 = arith.constant 0 : i32
    %161 = vector.broadcast %c0_i32_85 : i32 to vector<1x4xi32>
    %162 = arith.cmpi eq, %48, %161 : vector<1x4xi32>
    %cst_86 = arith.constant 0.000000e+00 : f32
    %163 = vector.broadcast %160 : f32 to vector<1x4xf32>
    %164 = vector.broadcast %cst_86 : f32 to vector<1x4xf32>
    %165 = arith.select %162, %163, %164 : vector<1x4xi1>, vector<1x4xf32>
    %166 = arith.addf %153, %165 : vector<1x4xf32>
    %c1_87 = arith.constant 1 : index
    %c0_88 = arith.constant 0 : index
    %c0_89 = arith.constant 0 : index
    %167 = vector.load %arg16[%c1_87, %c0_88, %c0_89] : memref<4x16x32xf32, #tpu.memory_space<vmem>>, vector<1x16x32xf32>
    %168 = vector.shape_cast %167 : vector<1x16x32xf32> to vector<16x32xf32>
    %169 = arith.mulf %47, %168 : vector<16x32xf32>
    %170 = vector.shape_cast %169 : vector<16x32xf32> to vector<1x16x32xf32>
    %cst_90 = arith.constant dense<0.000000e+00> : vector<1xf32>
    %171 = vector.multi_reduction <add>, %170, %cst_90 [1, 2] : vector<1x16x32xf32> to vector<1xf32>
    %172 = vector.shape_cast %171 : vector<1xf32> to vector<1x1x1xf32>
    %173 = vector.extract %172[0, 0, 0] : f32 from vector<1x1x1xf32>
    %c1_i32_91 = arith.constant 1 : i32
    %174 = vector.broadcast %c1_i32_91 : i32 to vector<1x4xi32>
    %175 = arith.cmpi eq, %48, %174 : vector<1x4xi32>
    %cst_92 = arith.constant 0.000000e+00 : f32
    %176 = vector.broadcast %173 : f32 to vector<1x4xf32>
    %177 = vector.broadcast %cst_92 : f32 to vector<1x4xf32>
    %178 = arith.select %175, %176, %177 : vector<1x4xi1>, vector<1x4xf32>
    %179 = arith.addf %166, %178 : vector<1x4xf32>
    %c2_93 = arith.constant 2 : index
    %c0_94 = arith.constant 0 : index
    %c0_95 = arith.constant 0 : index
    %180 = vector.load %arg16[%c2_93, %c0_94, %c0_95] : memref<4x16x32xf32, #tpu.memory_space<vmem>>, vector<1x16x32xf32>
    %181 = vector.shape_cast %180 : vector<1x16x32xf32> to vector<16x32xf32>
    %182 = arith.mulf %47, %181 : vector<16x32xf32>
    %183 = vector.shape_cast %182 : vector<16x32xf32> to vector<1x16x32xf32>
    %cst_96 = arith.constant dense<0.000000e+00> : vector<1xf32>
    %184 = vector.multi_reduction <add>, %183, %cst_96 [1, 2] : vector<1x16x32xf32> to vector<1xf32>
    %185 = vector.shape_cast %184 : vector<1xf32> to vector<1x1x1xf32>
    %186 = vector.extract %185[0, 0, 0] : f32 from vector<1x1x1xf32>
    %c2_i32_97 = arith.constant 2 : i32
    %187 = vector.broadcast %c2_i32_97 : i32 to vector<1x4xi32>
    %188 = arith.cmpi eq, %48, %187 : vector<1x4xi32>
    %cst_98 = arith.constant 0.000000e+00 : f32
    %189 = vector.broadcast %186 : f32 to vector<1x4xf32>
    %190 = vector.broadcast %cst_98 : f32 to vector<1x4xf32>
    %191 = arith.select %188, %189, %190 : vector<1x4xi1>, vector<1x4xf32>
    %192 = arith.addf %179, %191 : vector<1x4xf32>
    %c3_99 = arith.constant 3 : index
    %c0_100 = arith.constant 0 : index
    %c0_101 = arith.constant 0 : index
    %193 = vector.load %arg16[%c3_99, %c0_100, %c0_101] : memref<4x16x32xf32, #tpu.memory_space<vmem>>, vector<1x16x32xf32>
    %194 = vector.shape_cast %193 : vector<1x16x32xf32> to vector<16x32xf32>
    %195 = arith.mulf %47, %194 : vector<16x32xf32>
    %196 = vector.shape_cast %195 : vector<16x32xf32> to vector<1x16x32xf32>
    %cst_102 = arith.constant dense<0.000000e+00> : vector<1xf32>
    %197 = vector.multi_reduction <add>, %196, %cst_102 [1, 2] : vector<1x16x32xf32> to vector<1xf32>
    %198 = vector.shape_cast %197 : vector<1xf32> to vector<1x1x1xf32>
    %199 = vector.extract %198[0, 0, 0] : f32 from vector<1x1x1xf32>
    %c3_i32_103 = arith.constant 3 : i32
    %200 = vector.broadcast %c3_i32_103 : i32 to vector<1x4xi32>
    %201 = arith.cmpi eq, %48, %200 : vector<1x4xi32>
    %cst_104 = arith.constant 0.000000e+00 : f32
    %202 = vector.broadcast %199 : f32 to vector<1x4xf32>
    %203 = vector.broadcast %cst_104 : f32 to vector<1x4xf32>
    %204 = arith.select %201, %202, %203 : vector<1x4xi1>, vector<1x4xf32>
    %205 = arith.addf %192, %204 : vector<1x4xf32>
    %c0_105 = arith.constant 0 : index
    %c0_106 = arith.constant 0 : index
    %206 = vector.load %arg18[%c0_105, %c0_106] : memref<1x4xf32, #tpu.memory_space<vmem>>, vector<1x4xf32>
    tpu.vector_store %arg18[%c0_105, %c0_106], %205 {strides = array<i32>} : memref<1x4xf32, #tpu.memory_space<vmem>>, vector<1x4xf32>,
    return
  }
}

</mosaic_0001>

<bundles_post_ra>
// kernel: tpu_custom_call.1
= control target key start
LH: loop header
LB: loop body
LE: loop exit
PB: predicated region body
PF: predicated region fallthrough
CT: control target
= control target key end

     0   :  { %s2396_s0 = inlined_call_operand.hbm [shape: f32[16,16], index: 0, kind: input, shape index: {}]   ;;  %s2397_s1 = inlined_call_operand.hbm [shape: f32[16,16], index: 1, kind: input, shape index: {}]   ;;  %s2398_s2 = inlined_call_operand.hbm [shape: f32[16,32], index: 2, kind: input, shape index: {}]   ;;  %s2399_s3 = inlined_call_operand.vmem [shape: f32[1,32], index: 3, kind: input, shape index: {}]   ;;  %s2400_s4 = inlined_call_operand.hbm [shape: f32[32,32], index: 4, kind: input, shape index: {}]   ;;  %s2401_s5 = inlined_call_operand.vmem [shape: f32[1,32], index: 5, kind: input, shape index: {}]   ;;  %s2402_s6 = inlined_call_operand.vmem [shape: f32[1,32], index: 6, kind: input, shape index: {}]   ;;  %s2403_s7 = inlined_call_operand.vmem [shape: f32[1,32], index: 7, kind: input, shape index: {}]   ;;  %s2404_s8 = inlined_call_operand.hbm [shape: f32[32,32], index: 8, kind: input, shape index: {}]   ;;  %s2405_s9 = inlined_call_operand.vmem [shape: f32[1,32], index: 9, kind: input, shape index: {}]   ;;  %s2406_s10 = inlined_call_operand.hbm [shape: f32[32,32], index: 10, kind: input, shape index: {}]   ;;  %s2407_s11 = inlined_call_operand.vmem [shape: f32[1,32], index: 11, kind: input, shape index: {}]   ;;  %s2408_s12 = inlined_call_operand.vmem [shape: f32[1,32], index: 12, kind: input, shape index: {}]   ;;  %s2409_s13 = inlined_call_operand.vmem [shape: f32[1,32], index: 13, kind: input, shape index: {}]   ;;  %s2410_s14 = inlined_call_operand.hbm [shape: f32[4,16,16], index: 14, kind: input, shape index: {}]   ;;  %s2411_s15 = inlined_call_operand.hbm [shape: f32[4,16,32], index: 15, kind: input, shape index: {}]   ;;  %s2412_s16 = inlined_call_operand.hbm [shape: f32[4,16,32], index: 16, kind: input, shape index: {}]   ;;  %s2413_s17 = inlined_call_operand.vmem [shape: f32[1,4], index: 17, kind: input, shape index: {}]   ;;  %s2414_s18 = inlined_call_operand.hbm [shape: f32[1,4], index: 18, kind: output, shape index: {}]  }
   0x1   :  { %2415 = sst [smem:[#allocation24_spill]] %s2396_s0 }
   0x2   :  { %2416 = sst [smem:[#allocation25_spill]] %s2397_s1 }
   0x3   :  { %2417 = sst [smem:[#allocation26_spill]] %s2398_s2 }
   0x4   :  { %23 = vsyncpa [#allocation3], 0 }
   0x5   :  { %24 = vsyncpa [#allocation6], 0 }
   0x6   :  { %25 = vsyncpa [#allocation9], 0 }
   0x7   :  { %26 = vsyncpa [#allocation12], 0 }
   0x8   :  { %27 = vsyncpa [#allocation15], 0 }
   0x9   :  { %28 = vsyncpa [#allocation4], 0  ;;  %s2418_s29 = sld [smem:[#allocation25_spill]]  ;;  %s2083_s0 = smov [#allocation5]  }
   0xa   :  { %s48_s19 = sshll.u32 %s2083_s0, 4  ;;  %s74_s21 = sshll.u32 %s2400_s4, 4  ;;  %s49_s19 = int_to_ptr.vmem [resolvable:$true] %s48_s19  ;;  %s75_s21 = int_to_ptr.hbm [resolvable:$true] %s74_s21 }
   0xb   :  { %s2084_s22 = smov 128   ;;  %s2085_s2 = smov 8  }
   0xc   :  { %s2086_s23 = smov [#allocation8]   ;;  %s108_s27 = sshll.u32 %s2406_s10, 4  ;;  %s109_s27 = int_to_ptr.hbm [resolvable:$true] %s108_s27 }
   0xd   :  { %s76_s24 = sshll.u32 %s2086_s23, 4  ;;  %s2087_s0 = smov [#allocation11]   ;;  %s77_s24 = int_to_ptr.vmem [resolvable:$true] %s76_s24 }
   0xe   :  { %82 = dma.hbm_to_vmem [thread:$0]  %s75_s21, 512, %s77_s24, [#allocation9], %s2084_s22, %s2084_s22, %s2085_s2  }
   0xf   :  { %s46_s30 = sshll.u32 %s2418_s29, 4  ;;  %s140_s29 = sshll.u32 %s2411_s15, 4  ;;  %s47_s30 = int_to_ptr.hbm [resolvable:$true] %s46_s30  ;;  %s141_s29 = int_to_ptr.hbm [resolvable:$true] %s140_s29 }
  0x10   :  { %54 = dma.hbm_to_vmem [thread:$0]  %s47_s30, 256, %s49_s19, [#allocation6], %s2084_s22, %s2084_s22, %s2085_s2  }
  0x11   :  { %s110_s1 = sshll.u32 %s2087_s0, 4  ;;  %s2088_s30 = smov [#allocation14]   ;;  %s111_s1 = int_to_ptr.vmem [resolvable:$true] %s110_s1 }
  0x12   :  { %116 = dma.hbm_to_vmem [thread:$0]  %s109_s27, 512, %s111_s1, [#allocation12], %s2084_s22, %s2084_s22, %s2085_s2  }
  0x13   :  { %s142_s10 = sshll.u32 %s2088_s30, 4  ;;  %s2419_s23 = sld [smem:[#allocation24_spill]]  ;;  %s143_s10 = int_to_ptr.vmem [resolvable:$true] %s142_s10 }
  0x14   :  { %148 = dma.hbm_to_vmem [thread:$0]  %s141_s29, 1024, %s143_s10, [#allocation15], %s2084_s22, %s2084_s22, %s2085_s2  }
  0x15   :  { %s2420_s24 = sld [smem:[#allocation26_spill]]  ;;  %s2089_s4 = smov [#allocation2]  }
  0x16   :  { %s35_s28 = sshll.u32 %s2089_s4, 4  ;;  %s2090_s27 = smov [#allocation7]   ;;  %s36_s28 = int_to_ptr.vmem [resolvable:$true] %s35_s28 }
  0x17   :  { %s61_s0 = sshll.u32 %s2090_s27, 4  ;;  %s93_s19 = sshll.u32 %s2404_s8, 4  ;;  %s62_s0 = int_to_ptr.vmem [resolvable:$true] %s61_s0  ;;  %s94_s19 = int_to_ptr.hbm [resolvable:$true] %s93_s19 }
  0x18   :  { %s127_s20 = sshll.u32 %s2410_s14, 4  ;;  %s153_s4 = sshll.u32 %s2412_s16, 4  ;;  %s128_s20 = int_to_ptr.hbm [resolvable:$true] %s127_s20  ;;  %s154_s4 = int_to_ptr.hbm [resolvable:$true] %s153_s4 }
  0x19   :  { %s33_s25 = sshll.u32 %s2419_s23, 4  ;;  %s2091_s23 = smov [#allocation10]   ;;  %s34_s25 = int_to_ptr.hbm [resolvable:$true] %s33_s25 }
  0x1a   :  { %41 = dma.hbm_to_vmem [thread:$0]  %s34_s25, 256, %s36_s28, [#allocation3], %s2084_s22, %s2084_s22, %s2085_s2  }
  0x1b   :  { %s59_s26 = sshll.u32 %s2420_s24, 4  ;;  %s95_s15 = sshll.u32 %s2091_s23, 4  ;;  %s60_s26 = int_to_ptr.hbm [resolvable:$true] %s59_s26  ;;  %s96_s15 = int_to_ptr.vmem [resolvable:$true] %s95_s15 }
  0x1c   :  { %67 = dma.hbm_to_vmem [thread:$0]  %s60_s26, 256, %s62_s0, [#allocation6], %s2084_s22, %s2084_s22, %s2085_s2  }
  0x1d   :  { %101 = dma.hbm_to_vmem [thread:$0]  %s94_s19, 512, %s96_s15, [#allocation9], %s2084_s22, %s2084_s22, %s2085_s2  }
  0x1e   :  { %s2092_s25 = smov [#allocation13]   ;;  %s2093_s14 = smov [#allocation16]  }
  0x1f   :  { %s129_s8 = sshll.u32 %s2092_s25, 4  ;;  %s155_s26 = sshll.u32 %s2093_s14, 4  ;;  %s130_s8 = int_to_ptr.vmem [resolvable:$true] %s129_s8  ;;  %s156_s26 = int_to_ptr.vmem [resolvable:$true] %s155_s26 }
  0x20   :  { %135 = dma.hbm_to_vmem [thread:$0]  %s128_s20, 1024, %s130_s8, [#allocation12], %s2084_s22, %s2084_s22, %s2085_s2  }
  0x21   :  { %161 = dma.hbm_to_vmem [thread:$0]  %s154_s4, 1024, %s156_s26, [#allocation15], %s2084_s22, %s2084_s22, %s2085_s2  }
  0x22   :  { %2071 = dma.done.wait [#allocation3], 256  }
  0x23   :  { %2072 = vsyncadd [#allocation3], 4294967040 }
  0x24   :  { %2073 = dma.done.wait [#allocation6], 512  }
  0x25   :  { %2074 = vsyncadd [#allocation6], 4294966784 }
  0x26   :  { %2075 = dma.done.wait [#allocation9], 1024  }
  0x27   :  { %2076 = vsyncadd [#allocation9], 4294966272 }
  0x28   :  { %2077 = dma.done.wait [#allocation12], 1536  }
  0x29   :  { %2078 = vsyncadd [#allocation12], 4294965760 }
  0x2a   :  { %2079 = dma.done.wait [#allocation15], 2048  }
  0x2b   :  { %2080 = vsyncadd [#allocation15], 4294965248  ;;  %vm204_vm0 = vcmask 130048   ;;  %v2244_v0 = vld [vmem:[#allocation5 + $0x8] sm:$0xff]  ;;  %v2246_v1 = vld [vmem:[#allocation5] sm:$0xff]  ;;  %vm613_vm1 = vcmask 261120  }
  0x2c   :  { %v200_v2 = vld [vmem:[#allocation2] sm:$0xff]  ;;  %v225_v3 = vand.u32 4294901760, %v2244_v0  ;;  %v227_v4 = vand.u32 4294901760, %v2246_v1  ;;  %v201_v6 = vld [vmem:[#allocation2 + $0x8] sm:$0xff]  ;;  %s1773_s22 = sshll.u32 %s2414_s18, 4  ;;  %s2094_s2 = smov [#allocation17]   ;;  %s1774_s22 = int_to_ptr.hbm [resolvable:$true] %s1773_s22 }
  0x2d   :  { %v206_v5 = vsel %vm204_vm0, %v200_v2, 0  ;;  %v209_v8 = vsel %vm204_vm0, %v201_v6, 0  ;;  %v402_v26 = vld [vmem:[#allocation7 + $0x8] sm:$0xff]  ;;  %v401_v28 = vld [vmem:[#allocation7] sm:$0xff]  ;;  %vm1764_vm6 = vcmask 24576  }
  0x2e   :  { %v2251_v7 = vand.u32 4294901760, %v206_v5  ;;  %v261_v9 = vsub.f32 %v2244_v0, %v225_v3  ;;  %226 = vmatpush.msra.mxu0 %v225_v3  ;;  %v267_v10 = vsub.f32 %v2246_v1, %v227_v4  ;;  %327 = vmatpush.msra.mxu3 %v225_v3  ;;  %v2256_v11 = vand.u32 4294901760, %v209_v8 }
  0x2f   :  { %v427_v27 = vand.u32 4294901760, %v402_v26  ;;  %v429_v30 = vand.u32 4294901760, %v401_v28 }
  0x30   :  { %v2259_v12 = vsub.f32 %v206_v5, %v2251_v7  ;;  %297 = vmatpush.msra.mxu2 %v261_v9  ;;  %228 = vmatpush.msra.mxu0 %v227_v4  ;;  %v262_v13 = vand.u32 4294901760, %v261_v9  ;;  %v268_v14 = vand.u32 4294901760, %v267_v10  ;;  %v2262_v15 = vsub.f32 %v209_v8, %v2256_v11 }
  0x31   :  { %329 = vmatpush.msra.mxu3 %v227_v4  ;;  %v463_v29 = vsub.f32 %v402_v26, %v427_v27  ;;  %v469_v32 = vsub.f32 %v401_v28, %v429_v30 }
  0x32   :  { %v2265_v16 = vand.u32 4294901760, %v2259_v12  ;;  %300 = vmatpush.msra.mxu2 %v267_v10  ;;  %v263_v17 = vsub.f32 %v261_v9, %v262_v13  ;;  %v269_v18 = vsub.f32 %v267_v10, %v268_v14  ;;  %360 = vmatpush.msrb.mxu0 %v262_v13  ;;  %v2272_v20 = vand.u32 4294901760, %v2262_v15  ;;  %v608_v13 = vld [vmem:[#allocation8 + $0x18] sm:$0xff] }
  0x33   :  { %303 = vmatmul.f32.vlgmr.msra.gmra.mxu2 %v2259_v12  ;;  %v464_v31 = vand.u32 4294901760, %v463_v29  ;;  %v470_v34 = vand.u32 4294901760, %v469_v32 }
  0x34   :  { %v232_v19 = vsub.f32 %v2259_v12, %v2265_v16  ;;  %333 = vmatmul.f32.vlgmr.msra.gmra.mxu3 %v2265_v16  ;;  %v264_v21 = vand.u32 4294901760, %v263_v17  ;;  %v270_v22 = vand.u32 4294901760, %v269_v18  ;;  %364 = vmatpush.msrb.mxu0 %v268_v14  ;;  %v240_v24 = vsub.f32 %v2262_v15, %v2272_v20  ;;  %v607_v17 = vld [vmem:[#allocation8 + $0x10] sm:$0xff] }
  0x35   :  { %428 = vmatpush.msrb.mxu2 %v427_v27  ;;  %v465_v33 = vsub.f32 %v463_v29, %v464_v31  ;;  %v471_v36 = vsub.f32 %v469_v32, %v470_v34  ;;  %v632_v14 = vand.u32 4294901760, %v608_v13 }
  0x36   :  { %v2274_v23 = vand.u32 4294901760, %v232_v19  ;;  %265 = vmatpush.msra.mxu1 %v264_v21  ;;  %v2281_v25 = vand.u32 4294901760, %v240_v24  ;;  %v634_v19 = vand.u32 4294901760, %v607_v17  ;;  %v606_v21 = vld [vmem:[#allocation8 + $0x8] sm:$0xff] }
  0x37   :  { %430 = vmatpush.msrb.mxu2 %v429_v30  ;;  %v466_v35 = vand.u32 4294901760, %v465_v33  ;;  %v472_v37 = vand.u32 4294901760, %v471_v36  ;;  %v670_v18 = vsub.f32 %v608_v13, %v632_v14  ;;  %v636_v26 = vand.u32 4294901760, %v606_v21 }
  0x38   :  { %234 = vmatmul.f32.vlgmr.msra.gmra.mxu0 %v2274_v23  ;;  %271 = vmatpush.msra.mxu1 %v270_v22  ;;  %v676_v24 = vsub.f32 %v607_v17, %v634_v19 }
  0x39   :  { %273 = vmatmul.f32.vlgmr.msra.gmra.mxu1 %v2251_v7  ;;  %499 = vmatpush.msra.mxu0 %v463_v29  ;;  %v671_v22 = vand.u32 4294901760, %v670_v18 }
  0x3a   :  { %389 = vmatpush.msrb.mxu1 %v225_v3  ;;  %562 = vmatpush.msra.mxu2 %v464_v31  ;;  %v677_v29 = vand.u32 4294901760, %v676_v24 }
  0x3b   :  { %308 = vmatmul.f32.gmra.mxu2 %v2262_v15  ;;  %502 = vmatpush.msra.mxu0 %v469_v32  ;;  %v672_v28 = vsub.f32 %v670_v18, %v671_v22 }
  0x3c   :  { %339 = vmatmul.f32.gmra.mxu3 %v2272_v20  ;;  %391 = vmatpush.msrb.mxu1 %v227_v4  ;;  %v678_v33 = vsub.f32 %v676_v24, %v677_v29 }
  0x3d   :  { %566 = vmatpush.msra.mxu2 %v470_v34  ;;  %467 = vmatpush.msrb.mxu3 %v466_v35  ;;  %v673_v32 = vand.u32 4294901760, %v672_v28  ;;  %v1566_v28 = vld [vmem:[#allocation13 + $0x28] sm:$0xff] }
  0x3e   :  { %529 = vmatpush.msra.mxu1 %v427_v27  ;;  %v679_v36 = vand.u32 4294901760, %v678_v33 }
  0x3f   :  { %473 = vmatpush.msrb.mxu3 %v472_v37 }
  0x40   :  { %242 = vmatmul.f32.gmra.mxu0 %v2281_v25  ;;  %531 = vmatpush.msra.mxu1 %v429_v30 }
  0x41   :  { %277 = vmatmul.f32.gmra.mxu1 %v2256_v11  ;;  %591 = vmatpush.msra.mxu3 %v427_v27  ;;  %v605_v27 = vld [vmem:[#allocation8] sm:$0xff] }
  0x42   :  { %v638_v31 = vand.u32 4294901760, %v605_v27 }
  0x43   :  { %593 = vmatpush.msra.mxu3 %v429_v30  ;;  %v682_v30 = vsub.f32 %v606_v21, %v636_v26 }
  0x44   :  { %v688_v35 = vsub.f32 %v605_v27, %v638_v31  ;;  %v1565_v27 = vld [vmem:[#allocation13 + $0x20] sm:$0xff] }
  0x45   :  { %v683_v34 = vand.u32 4294901760, %v682_v30 }
  0x47   :  { %v684_v37 = vsub.f32 %v682_v30, %v683_v34 }
  0x48   :  { %366 = vmatmul.f32.vlgmr.msrb.gmra.mxu0 %v2251_v7 }
  0x49   :  { %393 = vmatmul.f32.vlgmr.msrb.gmra.mxu1 %v2251_v7  ;;  %633 = vmatpush.msrb.mxu0 %v632_v14 }
  0x4a   :  { %674 = vmatpush.msrb.mxu1 %v673_v32  ;;  %v1524_v32 = vld [vmem:[#allocation13 + $0x8] sm:$0xff] }
  0x4b   :  { %635 = vmatpush.msrb.mxu0 %v634_v19 }
  0x4c   :  { %680 = vmatpush.msrb.mxu1 %v679_v36 }
  0x4d   :  { %637 = vmatpush.msrb.mxu0 %v636_v26 }
  0x4f   :  { %639 = vmatpush.msrb.mxu0 %v638_v31 }
  0x50   :  { %370 = vmatmul.f32.gmra.mxu0 %v2256_v11 }
  0x51   :  { %397 = vmatmul.f32.gmra.mxu1 %v2256_v11 }
  0xb5   :  { %v235_v38 = vpop.f32.mrf.mxu0 }
  0xb6   :  { %v274_v39 = vpop.f32.mrf.mxu1  ;;  %v304_v40 = vpop.f32.mrf.mxu2 }
  0xb7   :  { %v275_v41 = vadd.f32 %v274_v39, %v235_v38  ;;  %v334_v43 = vpop.f32.mrf.mxu3  ;;  %v689_v38 = vand.u32 4294901760, %v688_v35  ;;  %v685_v39 = vand.u32 4294901760, %v684_v37 }
  0xb9   :  { %v305_v45 = vadd.f32 %v304_v40, %v275_v41  ;;  %v690_v40 = vsub.f32 %v688_v35, %v689_v38  ;;  %686 = vmatpush.msrb.mxu1 %v685_v39 }
  0xbb   :  { %v335_v46 = vadd.f32 %v334_v43, %v305_v45  ;;  %v691_v41 = vand.u32 4294901760, %v690_v40  ;;  %v1823_v43 = vld [vmem:[%s2399_s3] ss:$0 sm:$0xff] }
  0xbd   :  { %v243_v42 = vpop.f32.mrf.mxu0  ;;  %692 = vmatpush.msrb.mxu1 %v691_v41 }
  0xbe   :  { %v278_v44 = vpop.f32.mrf.mxu1  ;;  %v309_v48 = vpop.f32.mrf.mxu2 }
  0xbf   :  { %v279_v47 = vadd.f32 %v278_v44, %v243_v42  ;;  %v340_v54 = vpop.f32.mrf.mxu3 }
  0xc1   :  { %v310_v52 = vadd.f32 %v309_v48, %v279_v47 }
  0xc3   :  { %v341_v57 = vadd.f32 %v340_v54, %v310_v52 }
  0xc5   :  { %v367_v49 = vpop.f32.mrf.mxu0 }
  0xc6   :  { %v368_v50 = vadd.f32 %v367_v49, %v335_v46  ;;  %v394_v51 = vpop.f32.mrf.mxu1 }
  0xc8   :  { %v395_v53 = vadd.f32 %v394_v51, %v368_v50 }
  0xca   :  { %v408_v55 = vsel %vm204_vm0, %v395_v53, 0 }
  0xcb   :  { %v431_v56 = vand.u32 4294901760, %v408_v55 }
  0xcd   :  { %v432_v58 = vsub.f32 %v408_v55, %v431_v56  ;;  %v371_v59 = vpop.f32.mrf.mxu0  ;;  %475 = vmatmul.f32.vlgmr.msrb.gmra.mxu3 %v431_v56 }
  0xce   :  { %v372_v60 = vadd.f32 %v371_v59, %v341_v57  ;;  %v398_v61 = vpop.f32.mrf.mxu1  ;;  %750 = vmatpush.msrb.mxu3 %v632_v14 }
  0xcf   :  { %505 = vmatmul.f32.vlgmr.msra.gmra.mxu0 %v432_v58  ;;  %v433_v62 = vand.u32 4294901760, %v432_v58 }
  0xd0   :  { %v399_v63 = vadd.f32 %v398_v61, %v372_v60  ;;  %752 = vmatpush.msrb.mxu3 %v634_v19  ;;  %785 = vmatpush.msra.mxu0 %v671_v22 }
  0xd1   :  { %535 = vmatmul.f32.vlgmr.msra.gmra.mxu1 %v433_v62  ;;  %v434_v2 = vsub.f32 %v432_v58, %v433_v62 }
  0xd2   :  { %v411_v3 = vsel %vm204_vm0, %v399_v63, 0  ;;  %754 = vmatpush.msrb.mxu3 %v636_v26  ;;  %789 = vmatpush.msra.mxu0 %v677_v29  ;;  %v1567_v29 = vmul.f32 %v1565_v27, %v2246_v1 }
  0xd3   :  { %v439_v4 = vand.u32 4294901760, %v411_v3  ;;  %v435_v5 = vand.u32 4294901760, %v434_v2  ;;  %820 = vmatpush.msra.mxu1 %v632_v14 }
  0xd4   :  { %756 = vmatpush.msrb.mxu3 %v638_v31  ;;  %793 = vmatpush.msra.mxu0 %v683_v34  ;;  %v1526_v34 = vmul.f32 %v1524_v32, %v2244_v0 }
  0xd5   :  { %v440_v6 = vsub.f32 %v411_v3, %v439_v4  ;;  %436 = vmatmul.f32.vlgmr.msrb.gmra.mxu2 %v435_v5  ;;  %479 = vmatmul.f32.gmra.mxu3 %v439_v4 }
  0xd6   :  { %716 = vmatpush.msrb.mxu2 %v670_v18  ;;  %797 = vmatpush.msra.mxu0 %v689_v38  ;;  %v1528_v39 = vsel %vm204_vm0, %v1526_v34, 0.0  ;;  %v1646_v34 = vld [vmem:[#allocation14 + $0x20] sm:$0xff] }
  0xd7   :  { %510 = vmatmul.f32.gmra.mxu0 %v440_v6  ;;  %v441_v8 = vand.u32 4294901760, %v440_v6  ;;  %822 = vmatpush.msra.mxu1 %v634_v19 }
  0xd8   :  { %719 = vmatpush.msrb.mxu2 %v676_v24 }
  0xd9   :  { %541 = vmatmul.f32.gmra.mxu1 %v441_v8  ;;  %v442_v9 = vsub.f32 %v440_v6, %v441_v8 }
  0xda   :  { %722 = vmatpush.msrb.mxu2 %v682_v30  ;;  %824 = vmatpush.msra.mxu1 %v636_v26  ;;  %v1568_v30 = vmul.f32 %v1566_v28, %v2244_v0 }
  0xdb   :  { %v443_v10 = vand.u32 4294901760, %v442_v9 }
  0xdc   :  { %725 = vmatpush.msrb.mxu2 %v688_v35  ;;  %826 = vmatpush.msra.mxu1 %v638_v31  ;;  %v1523_v31 = vld [vmem:[#allocation13] sm:$0xff]  ;;  %v1569_v35 = vsel %vm204_vm0, %v1567_v29, 0.0  ;;  %v1570_v36 = vsel %vm204_vm0, %v1568_v30, 0.0 }
  0xdd   :  { %444 = vmatmul.f32.gmra.mxu2 %v443_v10  ;;  %595 = vmatmul.f32.vlgmr.msra.gmra.mxu3 %v431_v56  ;;  %v1525_v33 = vmul.f32 %v1523_v31, %v2246_v1  ;;  %v1571_v37 = vadd.f32 %v1570_v36, %v1569_v35  ;;  %v1606_v35 = vld [vmem:[#allocation14] sm:$0xff] }
  0xdf   :  { %v1527_v38 = vsel %vm204_vm0, %v1525_v33, 0.0  ;;  %1572 = vadd.xlane.f32.xlu1 %v1571_v37  ;;  %v1666_v33 = vld [vmem:[#allocation14 + $0x30] sm:$0xff]  ;;  %v1667_v37 = vld [vmem:[#allocation14 + $0x38] sm:$0xff] }
  0xe0   :  { %v1529_v40 = vadd.f32 %v1528_v39, %v1527_v38  ;;  %v1647_v39 = vld [vmem:[#allocation14 + $0x28] sm:$0xff] }
  0xe2   :  { %1530 = vadd.xlane.f32.xlu0 %v1529_v40 }
  0xe5   :  { %568 = vmatmul.f32.vlgmr.msra.gmra.mxu2 %v431_v56  ;;  %599 = vmatmul.f32.gmra.mxu3 %v439_v4 }
  0xed   :  { %572 = vmatmul.f32.gmra.mxu2 %v439_v4 }
 0x14c   :  { %v506_v48 = vpop.f32.mrf.mxu0 }
 0x14e   :  { %v536_v52 = vpop.f32.mrf.mxu1 }
 0x150   :  { %v476_v42 = vpop.f32.mrf.mxu3 }
 0x154   :  { %v511_v58 = vpop.f32.mrf.mxu0 }
 0x156   :  { %v542_v62 = vpop.f32.mrf.mxu1 }
 0x158   :  { %v437_v44 = vpop.f32.mrf.mxu2  ;;  %v480_v46 = vpop.f32.mrf.mxu3 }
 0x159   :  { %v438_v45 = vadd.f32 %v1823_v43, %v437_v44  ;;  %v1544_v44 = vld [vmem:[#allocation13 + $0x10] sm:$0xff] }
 0x15b   :  { %v477_v47 = vadd.f32 %v476_v42, %v438_v45  ;;  %v1586_v42 = vld [vmem:[#allocation13 + $0x30] sm:$0xff] }
 0x15c   :  { %v1588_v45 = vmul.f32 %v1586_v42, %v2246_v1 }
 0x15d   :  { %v507_v51 = vadd.f32 %v506_v48, %v477_v47  ;;  %v1545_v47 = vld [vmem:[#allocation13 + $0x18] sm:$0xff]  ;;  %v1546_v48 = vmul.f32 %v1544_v44, %v2246_v1 }
 0x15f   :  { %v537_v54 = vadd.f32 %v536_v52, %v507_v51  ;;  %v1590_v52 = vsel %vm204_vm0, %v1588_v45, 0.0 }
 0x160   :  { %v445_v49 = vpop.f32.mrf.mxu2  ;;  %v596_v55 = vpop.f32.mrf.mxu3 }
 0x161   :  { %v446_v50 = vadd.f32 %v1823_v43, %v445_v49  ;;  %v1587_v43 = vld [vmem:[#allocation13 + $0x38] sm:$0xff]  ;;  %v1824_v49 = vld [vmem:[%s2401_s5] ss:$0 sm:$0xff]  ;;  %s1771_s5 = sshll.u32 %s2094_s2, 4  ;;  %s1772_s5 = int_to_ptr.vmem [resolvable:$true] %s1771_s5 }
 0x163   :  { %v481_v53 = vadd.f32 %v480_v46, %v446_v50  ;;  %v1589_v46 = vmul.f32 %v1587_v43, %v2244_v0  ;;  %v1547_v50 = vmul.f32 %v1545_v47, %v2244_v0 }
 0x165   :  { %v512_v60 = vadd.f32 %v511_v58, %v481_v53  ;;  %v1591_v53 = vsel %vm204_vm0, %v1589_v46, 0.0 }
 0x167   :  { %v543_v2 = vadd.f32 %v542_v62, %v512_v60 }
 0x168   :  { %v569_v56 = vpop.f32.mrf.mxu2  ;;  %v600_v8 = vpop.f32.mrf.mxu3 }
 0x169   :  { %v570_v57 = vadd.f32 %v569_v56, %v537_v54  ;;  %v1548_v54 = vsel %vm204_vm0, %v1546_v48, 0.0  ;;  %v1549_v56 = vsel %vm204_vm0, %v1547_v50, 0.0 }
 0x16b   :  { %v597_v59 = vadd.f32 %v596_v55, %v570_v57  ;;  %v1592_v55 = vadd.f32 %v1591_v53, %v1590_v52  ;;  %v1550_v57 = vadd.f32 %v1549_v56, %v1548_v54 }
 0x16d   :  { %v603_v61 = vmax.f32 %v597_v59, 0.0  ;;  %1593 = vadd.xlane.f32.xlu1 %v1592_v55  ;;  %1551 = vadd.xlane.f32.xlu0 %v1550_v57  ;;  %v1627_v57 = vld [vmem:[#allocation14 + $0x18] sm:$0xff] }
 0x16f   :  { %v615_v63 = vsel %vm613_vm1, %v603_v61, 0 }
 0x170   :  { %v640_v3 = vand.u32 4294901760, %v615_v63  ;;  %v573_v4 = vpop.f32.mrf.mxu2 }
 0x171   :  { %v574_v5 = vadd.f32 %v573_v4, %v543_v2 }
 0x172   :  { %v641_v6 = vsub.f32 %v615_v63, %v640_v3  ;;  %694 = vmatmul.f32.vlgmr.msrb.gmra.mxu1 %v640_v3 }
 0x173   :  { %v601_v9 = vadd.f32 %v600_v8, %v574_v5 }
 0x174   :  { %728 = vmatmul.f32.vlgmr.msrb.gmra.mxu2 %v641_v6  ;;  %v642_v10 = vand.u32 4294901760, %v641_v6 }
 0x175   :  { %v604_v13 = vmax.f32 %v601_v9, 0.0 }
 0x176   :  { %760 = vmatmul.f32.vlgmr.msrb.gmra.mxu3 %v642_v10  ;;  %v643_v14 = vsub.f32 %v641_v6, %v642_v10 }
 0x177   :  { %v618_v17 = vsel %vm613_vm1, %v604_v13, 0  ;;  %v1825_v13 = vld [vmem:[%s2402_s6] ss:$0 sm:$0xff] }
 0x178   :  { %v648_v18 = vand.u32 4294901760, %v618_v17  ;;  %v644_v19 = vand.u32 4294901760, %v643_v14 }
 0x17a   :  { %645 = vmatmul.f32.vlgmr.msrb.gmra.mxu0 %v644_v19  ;;  %698 = vmatmul.f32.gmra.mxu1 %v648_v18  ;;  %v649_v21 = vsub.f32 %v618_v17, %v648_v18  ;;  %v1826_v17 = vld [vmem:[%s2403_s7] ss:$0 sm:$0xff] }
 0x17c   :  { %733 = vmatmul.f32.gmra.mxu2 %v649_v21  ;;  %v650_v22 = vand.u32 4294901760, %v649_v21 }
 0x17e   :  { %766 = vmatmul.f32.gmra.mxu3 %v650_v22  ;;  %v651_v24 = vsub.f32 %v649_v21, %v650_v22 }
 0x180   :  { %v652_v26 = vand.u32 4294901760, %v651_v24 }
 0x182   :  { %653 = vmatmul.f32.gmra.mxu0 %v652_v26  ;;  %828 = vmatmul.f32.vlgmr.msra.gmra.mxu1 %v640_v3 }
 0x18a   :  { %799 = vmatmul.f32.vlgmr.msra.gmra.mxu0 %v640_v3  ;;  %832 = vmatmul.f32.gmra.mxu1 %v648_v18 }
 0x192   :  { %803 = vmatmul.f32.gmra.mxu0 %v648_v18 }
 0x1ef   :  { %v695_v41 = vpop.f32.mrf.mxu1 }
 0x1f7   :  { %v646_v51 = vpop.f32.mrf.mxu0  ;;  %v699_v1 = vpop.f32.mrf.mxu1 }
 0x1f8   :  { %v647_v58 = vadd.f32 %v1824_v49, %v646_v51  ;;  %v729_v60 = vpop.f32.mrf.mxu2 }
 0x1f9   :  { %v761_v63 = vpop.f32.mrf.mxu3 }
 0x1fa   :  { %v696_v59 = vadd.f32 %v695_v41, %v647_v58  ;;  %v1607_v41 = vld [vmem:[#allocation14 + $0x8] sm:$0xff] }
 0x1fc   :  { %v730_v62 = vadd.f32 %v729_v60, %v696_v59 }
 0x1fe   :  { %v762_v2 = vadd.f32 %v761_v63, %v730_v62 }
 0x1ff   :  { %v654_v61 = vpop.f32.mrf.mxu0  ;;  %v829_v4 = vpop.f32.mrf.mxu1 }
 0x200   :  { %v655_v0 = vadd.f32 %v1824_v49, %v654_v61  ;;  %v734_v8 = vpop.f32.mrf.mxu2  ;;  %v1626_v61 = vld [vmem:[#allocation14 + $0x10] sm:$0xff] }
 0x201   :  { %v767_v18 = vpop.f32.mrf.mxu3 }
 0x202   :  { %v700_v3 = vadd.f32 %v699_v1, %v655_v0 }
 0x204   :  { %v735_v9 = vadd.f32 %v734_v8, %v700_v3 }
 0x206   :  { %v768_v19 = vadd.f32 %v767_v18, %v735_v9 }
 0x207   :  { %v800_v5 = vpop.f32.mrf.mxu0  ;;  %v833_v27 = vpop.f32.mrf.mxu1 }
 0x208   :  { %v801_v6 = vadd.f32 %v800_v5, %v762_v2 }
 0x20a   :  { %v830_v10 = vadd.f32 %v829_v4, %v801_v6 }
 0x20c   :  { %v836_v14 = vmax.f32 %v830_v10, 0.0 }
 0x20e   :  { %v842_v21 = vmul.f32 %v1825_v13, %v836_v14 }
 0x20f   :  { %v804_v22 = vpop.f32.mrf.mxu0 }
 0x210   :  { %v848_v24 = vadd.f32 %v1826_v17, %v842_v21  ;;  %v805_v26 = vadd.f32 %v804_v22, %v768_v19 }
 0x212   :  { %v850_v28 = vmax.f32 %v848_v24, 0.0  ;;  %v834_v29 = vadd.f32 %v833_v27, %v805_v26 }
 0x214   :  { %v837_v30 = vmax.f32 %v834_v29, 0.0  ;;  %v868_v31 = vand.u32 4294901760, %v850_v28  ;;  %v1668_v38 = vmul.f32 %v1666_v33, %v850_v28  ;;  %v1648_v40 = vmul.f32 %v1646_v34, %v850_v28 }
 0x215   :  { %v1608_v42 = vmul.f32 %v1606_v35, %v850_v28  ;;  %v1628_v2 = vmul.f32 %v1626_v61, %v850_v28 }
 0x216   :  { %v843_v32 = vmul.f32 %v1825_v13, %v837_v30  ;;  %v908_v43 = vsub.f32 %v850_v28, %v868_v31  ;;  %v1670_v49 = vsel %vm613_vm1, %v1668_v38, 0.0  ;;  %v1650_v50 = vsel %vm613_vm1, %v1648_v40, 0.0 }
 0x217   :  { %v1610_v51 = vsel %vm613_vm1, %v1608_v42, 0.0  ;;  %v1630_v6 = vsel %vm613_vm1, %v1628_v2, 0.0  ;;  %v1044_v42 = vld [vmem:[#allocation10 + $0x10] sm:$0xff] }
 0x218   :  { %v849_v36 = vadd.f32 %v1826_v17, %v843_v32  ;;  %v909_v52 = vand.u32 4294901760, %v908_v43 }
 0x21a   :  { %v851_v44 = vmax.f32 %v849_v36, 0.0  ;;  %v910_v63 = vsub.f32 %v908_v43, %v909_v52  ;;  %v1045_v36 = vld [vmem:[#allocation10 + $0x18] sm:$0xff] }
 0x21b   :  { %v2342_v38 = vand.u32 4294901760, %v1045_v36 }
 0x21c   :  { %v866_v45 = vand.u32 4294901760, %v851_v44  ;;  %v1669_v46 = vmul.f32 %v1667_v37, %v851_v44  ;;  %v1649_v47 = vmul.f32 %v1647_v39, %v851_v44  ;;  %v1609_v48 = vmul.f32 %v1607_v41, %v851_v44 }
 0x21d   :  { %v1629_v62 = vmul.f32 %v1627_v57, %v851_v44  ;;  %v911_v5 = vand.u32 4294901760, %v910_v63 }
 0x21e   :  { %867 = vmatpush.msra.mxu2 %v866_v45  ;;  %968 = vmatpush.msrb.mxu1 %v866_v45  ;;  %v902_v53 = vsub.f32 %v851_v44, %v866_v45  ;;  %v1671_v54 = vsel %vm613_vm1, %v1669_v46, 0.0  ;;  %v1651_v55 = vsel %vm613_vm1, %v1649_v47, 0.0  ;;  %v1611_v56 = vsel %vm613_vm1, %v1609_v48, 0.0  ;;  %v1043_v47 = vld [vmem:[#allocation10 + $0x8] sm:$0xff] }
 0x21f   :  { %v1672_v58 = vadd.f32 %v1671_v54, %v1670_v49  ;;  %v1652_v1 = vadd.f32 %v1651_v55, %v1650_v50  ;;  %v1612_v59 = vadd.f32 %v1611_v56, %v1610_v51  ;;  %v1631_v4 = vsel %vm613_vm1, %v1629_v62, 0.0 }
 0x220   :  { %869 = vmatpush.msra.mxu2 %v868_v31  ;;  %938 = vmatpush.msrb.mxu0 %v902_v53  ;;  %v903_v60 = vand.u32 4294901760, %v902_v53  ;;  %v1632_v8 = vadd.f32 %v1631_v4, %v1630_v6  ;;  %v2345_v46 = vand.u32 4294901760, %v1044_v42 }
 0x221   :  { %970 = vmatpush.msrb.mxu1 %v868_v31  ;;  %1673 = vadd.xlane.f32.xlu1 %v1672_v58 }
 0x222   :  { %1653 = vadd.xlane.f32.xlu0 %v1652_v1  ;;  %1613 = vadd.xlane.f32.xlu2 %v1612_v59  ;;  %v904_v0 = vsub.f32 %v902_v53, %v903_v60  ;;  %v1112_v50 = vsub.f32 %v1044_v42, %v2345_v46  ;;  %v1042_v53 = vld [vmem:[#allocation10] sm:$0xff] }
 0x223   :  { %941 = vmatpush.msrb.mxu0 %v908_v43  ;;  %1001 = vmatpush.msrb.mxu2 %v903_v60  ;;  %v1074_v1 = vand.u32 4294901760, %v1042_v53 }
 0x224   :  { %v905_v3 = vand.u32 4294901760, %v904_v0  ;;  %875 = vmatmul.f32.vlgmr.msra.gmra.mxu2 %v2274_v23  ;;  %944 = vmatmul.f32.vlgmr.msrb.gmra.mxu0 %v2259_v12  ;;  %v1573_v12 = vpop.xlane.xlu1 %1572  ;;  %v1113_v57 = vand.u32 4294901760, %v1112_v50 }
 0x225   :  { %1005 = vmatpush.msrb.mxu2 %v909_v52  ;;  %974 = vmatmul.f32.vlgmr.msrb.gmra.mxu1 %v2265_v16  ;;  %v1531_v16 = vpop.xlane.xlu0 %1530  ;;  %v1574_v9 = vrot.slane %v1573_v12, 4  ;;  %v1072_v52 = vand.u32 4294901760, %v1043_v47  ;;  %v1124_v2 = vsub.f32 %v1042_v53, %v1074_v1 }
 0x226   :  { %906 = vmatpush.msra.mxu3 %v905_v3  ;;  %v1532_v23 = vrot.slane %v1531_v16, 4  ;;  %1069 = vmatpush.msra.mxu0 %v2342_v38  ;;  %v1114_v61 = vsub.f32 %v1112_v50, %v1113_v57 }
 0x227   :  { %v1575_v17 = vadd.f32 %v1574_v9, %v1573_v12  ;;  %v1118_v58 = vsub.f32 %v1043_v47, %v1072_v52  ;;  %v1125_v12 = vand.u32 4294901760, %v1124_v2 }
 0x228   :  { %912 = vmatpush.msra.mxu3 %v911_v5  ;;  %v1533_v10 = vadd.f32 %v1532_v23, %v1531_v16  ;;  %1071 = vmatpush.msra.mxu0 %v2345_v46  ;;  %v1115_v6 = vand.u32 4294901760, %v1114_v61 }
 0x229   :  { %914 = vmatmul.f32.vlgmr.msra.gmra.mxu3 %v2251_v7  ;;  %v1576_v22 = vrot.slane %v1575_v17, 2  ;;  %v1119_v63 = vand.u32 4294901760, %v1118_v58 }
 0x22a   :  { %1633 = vadd.xlane.f32.xlu2 %v1632_v8  ;;  %1030 = vmatpush.msrb.mxu3 %v866_v45  ;;  %v1534_v18 = vrot.slane %v1533_v10, 2  ;;  %v1106_v45 = vsub.f32 %v1045_v36, %v2342_v38 }
 0x22b   :  { %v1577_v29 = vadd.f32 %v1576_v22, %v1575_v17  ;;  %1073 = vmatpush.msra.mxu0 %v1072_v52  ;;  %v1120_v8 = vsub.f32 %v1118_v58, %v1119_v63 }
 0x22c   :  { %1032 = vmatpush.msrb.mxu3 %v868_v31  ;;  %883 = vmatmul.f32.gmra.mxu2 %v2281_v25  ;;  %v1594_v13 = vpop.xlane.xlu1 %1593  ;;  %v1107_v49 = vand.u32 4294901760, %v1106_v45 }
 0x22d   :  { %949 = vmatmul.f32.gmra.mxu0 %v2262_v15  ;;  %980 = vmatmul.f32.gmra.mxu1 %v2272_v20  ;;  %v1552_v25 = vpop.xlane.xlu0 %1551  ;;  %v1595_v14 = vrot.slane %v1594_v13, 4  ;;  %v1578_v31 = vrot.slane %v1577_v29, 1 }
 0x22e   :  { %v1553_v15 = vrot.slane %v1552_v25, 4  ;;  %1186 = vmatpush.msra.mxu3 %v2342_v38  ;;  %1152 = vmatpush.msra.mxu2 %v1106_v45  ;;  %v1108_v56 = vsub.f32 %v1106_v45, %v1107_v49 }
 0x22f   :  { %v1596_v19 = vadd.f32 %v1595_v14, %v1594_v13  ;;  %v1579_v33 = vadd.f32 %v1578_v31, %v1577_v29  ;;  %1075 = vmatpush.msra.mxu0 %v1074_v1 }
 0x230   :  { %v1554_v20 = vadd.f32 %v1553_v15, %v1552_v25  ;;  %1188 = vmatpush.msra.mxu3 %v2345_v46  ;;  %1155 = vmatpush.msra.mxu2 %v1112_v50  ;;  %v1109_v60 = vand.u32 4294901760, %v1108_v56  ;;  %v1126_v25 = vsub.f32 %v1124_v2, %v1125_v12 }
 0x231   :  { %918 = vmatmul.f32.gmra.mxu3 %v2256_v11  ;;  %v1597_v24 = vrot.slane %v1596_v19, 2  ;;  %1221 = vmatpush.msrb.mxu0 %v1107_v49 }
 0x232   :  { %v1555_v21 = vrot.slane %v1554_v20, 2  ;;  %1190 = vmatpush.msra.mxu3 %v1072_v52  ;;  %1158 = vmatpush.msra.mxu2 %v1118_v58  ;;  %v1127_v14 = vand.u32 4294901760, %v1126_v25  ;;  %v1277_v58 = vld [vmem:[#allocation11 + $0x18] sm:$0xff] }
 0x233   :  { %v1598_v32 = vadd.f32 %v1597_v24, %v1596_v19  ;;  %1110 = vmatpush.msra.mxu1 %v1109_v60  ;;  %1225 = vmatpush.msrb.mxu0 %v1113_v57 }
 0x234   :  { %1007 = vmatmul.f32.vlgmr.msrb.gmra.mxu2 %v2251_v7  ;;  %v1556_v27 = vadd.f32 %v1555_v21, %v1554_v20  ;;  %1192 = vmatpush.msra.mxu3 %v1074_v1 }
 0x235   :  { %v1599_v34 = vrot.slane %v1598_v32, 1  ;;  %1161 = vmatpush.msra.mxu2 %v1124_v2  ;;  %1116 = vmatpush.msra.mxu1 %v1115_v6 }
 0x236   :  { %v1557_v28 = vrot.slane %v1556_v27, 1  ;;  %1229 = vmatpush.msrb.mxu0 %v1119_v63 }
 0x237   :  { %v1600_v35 = vadd.f32 %v1599_v34, %v1598_v32 }
 0x238   :  { %v1558_v30 = vadd.f32 %v1557_v28, %v1556_v27  ;;  %1233 = vmatpush.msrb.mxu0 %v1125_v12 }
 0x239   :  { %1034 = vmatmul.f32.vlgmr.msrb.gmra.mxu3 %v2251_v7  ;;  %v1535_v7 = vadd.f32 %v1534_v18, %v1533_v10  ;;  %v1121_v10 = vand.u32 4294901760, %v1120_v8 }
 0x23b   :  { %v1536_v26 = vrot.slane %v1535_v7, 1  ;;  %1122 = vmatpush.msra.mxu1 %v1121_v10 }
 0x23c   :  { %1011 = vmatmul.f32.gmra.mxu2 %v2256_v11 }
 0x23d   :  { %1128 = vmatpush.msra.mxu1 %v1127_v14 }
 0x23f   :  { %1256 = vmatpush.msrb.mxu1 %v2342_v38 }
 0x241   :  { %1038 = vmatmul.f32.gmra.mxu3 %v2256_v11  ;;  %v1537_v11 = vadd.f32 %v1536_v26, %v1535_v7  ;;  %1258 = vmatpush.msrb.mxu1 %v2345_v46 }
 0x243   :  { %1787 = vpush %v1537_v11  ;;  %1260 = vmatpush.msrb.mxu1 %v1072_v52 }
 0x244   :  { %1789 = vpush %v1558_v30 }
 0x245   :  { %1791 = vpush %v1579_v33  ;;  %1262 = vmatpush.msrb.mxu1 %v1074_v1  ;;  %v1300_v1 = vand.u32 4294901760, %v1277_v58 }
 0x246   :  { %1793 = vpush %v1600_v35 }
 0x247   :  { %v1338_v60 = vsub.f32 %v1277_v58, %v1300_v1  ;;  %1301 = vmatpush.msrb.mxu2 %v1300_v1  ;;  %v1828_v58 = vld [vmem:[%s2407_s11] ss:$0 sm:$0xff] }
 0x294   :  { %v1674_v37 = vpop.xlane.xlu1 %1673 }
 0x295   :  { %v1675_v39 = vrot.slane %v1674_v37, 4  ;;  %v1654_v40 = vpop.xlane.xlu0 %1653  ;;  %v1614_v41 = vpop.xlane.xlu2 %1613 }
 0x296   :  { %v1655_v43 = vrot.slane %v1654_v40, 4  ;;  %v1615_v44 = vrot.slane %v1614_v41, 4 }
 0x297   :  { %v1676_v54 = vadd.f32 %v1675_v39, %v1674_v37 }
 0x298   :  { %v1616_v48 = vadd.f32 %v1615_v44, %v1614_v41  ;;  %v1656_v51 = vadd.f32 %v1655_v43, %v1654_v40 }
 0x299   :  { %v1677_v3 = vrot.slane %v1676_v54, 2 }
 0x29a   :  { %v1617_v55 = vrot.slane %v1616_v48, 2  ;;  %v1657_v62 = vrot.slane %v1656_v51, 2 }
 0x29b   :  { %v1678_v15 = vadd.f32 %v1677_v3, %v1676_v54  ;;  %v1274_v3 = vld [vmem:[#allocation11] sm:$0xff] }
 0x29c   :  { %v1618_v59 = vadd.f32 %v1617_v55, %v1616_v48  ;;  %v1658_v9 = vadd.f32 %v1657_v62, %v1656_v51  ;;  %v1275_v62 = vld [vmem:[#allocation11 + $0x8] sm:$0xff]  ;;  %v1306_v8 = vand.u32 4294901760, %v1274_v3 }
 0x29d   :  { %v1634_v0 = vpop.xlane.xlu2 %1633  ;;  %v1679_v19 = vrot.slane %v1678_v15, 1  ;;  %v1304_v2 = vand.u32 4294901760, %v1275_v62 }
 0x29e   :  { %v1635_v4 = vrot.slane %v1634_v0, 4  ;;  %v1619_v5 = vrot.slane %v1618_v59, 1  ;;  %v1659_v17 = vrot.slane %v1658_v9, 1 }
 0x29f   :  { %v1680_v24 = vadd.f32 %v1679_v19, %v1678_v15  ;;  %v1350_v6 = vsub.f32 %v1275_v62, %v1304_v2 }
 0x2a0   :  { %v1636_v16 = vadd.f32 %v1635_v4, %v1634_v0  ;;  %v1620_v23 = vadd.f32 %v1619_v5, %v1618_v59  ;;  %v1660_v7 = vadd.f32 %v1659_v17, %v1658_v9  ;;  %v1276_v59 = vld [vmem:[#allocation11 + $0x10] sm:$0xff]  ;;  %v1339_v0 = vand.u32 4294901760, %v1338_v60 }
 0x2a1   :  { %v945_v11 = vpop.f32.mrf.mxu0  ;;  %v1302_v61 = vand.u32 4294901760, %v1276_v59  ;;  %v1356_v9 = vsub.f32 %v1274_v3, %v1306_v8 }
 0x2a2   :  { %v1637_v13 = vrot.slane %v1636_v16, 2  ;;  %1795 = vpush %v1620_v23  ;;  %v975_v30 = vpop.f32.mrf.mxu1  ;;  %v1340_v4 = vsub.f32 %v1338_v60, %v1339_v0  ;;  %v1351_v23 = vand.u32 4294901760, %v1350_v6 }
 0x2a3   :  { %v1344_v63 = vsub.f32 %v1276_v59, %v1302_v61  ;;  %1303 = vmatpush.msrb.mxu2 %v1302_v61 }
 0x2a4   :  { %v1638_v20 = vadd.f32 %v1637_v13, %v1636_v16  ;;  %v1341_v12 = vand.u32 4294901760, %v1340_v4  ;;  %v1352_v25 = vsub.f32 %v1350_v6, %v1351_v23  ;;  %v1357_v13 = vand.u32 4294901760, %v1356_v9 }
 0x2a5   :  { %v1345_v5 = vand.u32 4294901760, %v1344_v63  ;;  %1305 = vmatpush.msrb.mxu2 %v1304_v2 }
 0x2a6   :  { %v1639_v18 = vrot.slane %v1638_v20, 1  ;;  %1342 = vmatpush.msrb.mxu3 %v1341_v12  ;;  %v1353_v15 = vand.u32 4294901760, %v1352_v25  ;;  %v1358_v14 = vsub.f32 %v1356_v9, %v1357_v13 }
 0x2a7   :  { %v876_v21 = vpop.f32.mrf.mxu2  ;;  %v1346_v16 = vsub.f32 %v1344_v63, %v1345_v5  ;;  %1307 = vmatpush.msrb.mxu2 %v1306_v8 }
 0x2a8   :  { %v1640_v22 = vadd.f32 %v1639_v18, %v1638_v20  ;;  %v1359_v20 = vand.u32 4294901760, %v1358_v14  ;;  %v1827_v18 = vld [vmem:[%s2405_s9] ss:$0 sm:$0xff] }
 0x2a9   :  { %v1347_v10 = vand.u32 4294901760, %v1346_v16 }
 0x2aa   :  { %1797 = vpush %v1640_v22  ;;  %v950_v35 = vpop.f32.mrf.mxu0  ;;  %v981_v40 = vpop.f32.mrf.mxu1 }
 0x2ab   :  { %1799 = vpush %v1660_v7  ;;  %1348 = vmatpush.msrb.mxu3 %v1347_v10 }
 0x2ac   :  { %1801 = vpush %v1680_v24  ;;  %v915_v26 = vpop.f32.mrf.mxu3 }
 0x2ad   :  { %v916_v28 = vadd.f32 %v915_v26, %v876_v21  ;;  %1354 = vmatpush.msrb.mxu3 %v1353_v15  ;;  %v1830_v15 = vld [vmem:[%s2409_s13] ss:$0 sm:$0xff] }
 0x2af   :  { %v884_v27 = vpop.f32.mrf.mxu2  ;;  %v946_v31 = vadd.f32 %v945_v11, %v916_v28  ;;  %1360 = vmatpush.msrb.mxu3 %v1359_v20 }
 0x2b1   :  { %v976_v34 = vadd.f32 %v975_v30, %v946_v31 }
 0x2b4   :  { %v919_v29 = vpop.f32.mrf.mxu3 }
 0x2b5   :  { %v920_v33 = vadd.f32 %v919_v29, %v884_v27 }
 0x2b7   :  { %v1008_v32 = vpop.f32.mrf.mxu2  ;;  %v951_v39 = vadd.f32 %v950_v35, %v920_v33 }
 0x2b8   :  { %v1009_v36 = vadd.f32 %v1008_v32, %v976_v34 }
 0x2b9   :  { %v982_v44 = vadd.f32 %v981_v40, %v951_v39 }
 0x2bc   :  { %v1035_v37 = vpop.f32.mrf.mxu3 }
 0x2bd   :  { %v1036_v38 = vadd.f32 %v1035_v37, %v1009_v36 }
 0x2bf   :  { %v1051_v41 = vsel %vm613_vm1, %v1036_v38, 0  ;;  %v1012_v43 = vpop.f32.mrf.mxu2 }
 0x2c0   :  { %v1076_v42 = vand.u32 4294901760, %v1051_v41  ;;  %v1013_v46 = vadd.f32 %v1012_v43, %v982_v44 }
 0x2c2   :  { %v1077_v45 = vsub.f32 %v1051_v41, %v1076_v42  ;;  %1130 = vmatmul.f32.vlgmr.msra.gmra.mxu1 %v1076_v42 }
 0x2c3   :  { %1418 = vmatpush.msra.mxu1 %v1300_v1 }
 0x2c4   :  { %v1039_v47 = vpop.f32.mrf.mxu3  ;;  %1164 = vmatmul.f32.vlgmr.msra.gmra.mxu2 %v1077_v45  ;;  %v1078_v48 = vand.u32 4294901760, %v1077_v45 }
 0x2c5   :  { %v1040_v49 = vadd.f32 %v1039_v47, %v1013_v46  ;;  %1420 = vmatpush.msra.mxu1 %v1302_v61  ;;  %1453 = vmatpush.msra.mxu2 %v1339_v0 }
 0x2c6   :  { %1196 = vmatmul.f32.vlgmr.msra.gmra.mxu3 %v1078_v48  ;;  %v1079_v50 = vsub.f32 %v1077_v45, %v1078_v48 }
 0x2c7   :  { %v1054_v51 = vsel %vm613_vm1, %v1040_v49, 0  ;;  %1422 = vmatpush.msra.mxu1 %v1304_v2  ;;  %1457 = vmatpush.msra.mxu2 %v1345_v5 }
 0x2c8   :  { %v1084_v52 = vand.u32 4294901760, %v1054_v51  ;;  %v1080_v53 = vand.u32 4294901760, %v1079_v50  ;;  %1488 = vmatpush.msra.mxu3 %v1300_v1 }
 0x2c9   :  { %1424 = vmatpush.msra.mxu1 %v1306_v8  ;;  %1461 = vmatpush.msra.mxu2 %v1351_v23 }
 0x2ca   :  { %v1085_v54 = vsub.f32 %v1054_v51, %v1084_v52  ;;  %1081 = vmatmul.f32.vlgmr.msra.gmra.mxu0 %v1080_v53  ;;  %1134 = vmatmul.f32.gmra.mxu1 %v1084_v52 }
 0x2cb   :  { %1384 = vmatpush.msra.mxu0 %v1338_v60  ;;  %1465 = vmatpush.msra.mxu2 %v1357_v13 }
 0x2cc   :  { %1169 = vmatmul.f32.gmra.mxu2 %v1085_v54  ;;  %v1086_v55 = vand.u32 4294901760, %v1085_v54  ;;  %1490 = vmatpush.msra.mxu3 %v1302_v61 }
 0x2cd   :  { %1387 = vmatpush.msra.mxu0 %v1344_v63 }
 0x2ce   :  { %1202 = vmatmul.f32.gmra.mxu3 %v1086_v55  ;;  %v1087_v56 = vsub.f32 %v1085_v54, %v1086_v55 }
 0x2cf   :  { %1390 = vmatpush.msra.mxu0 %v1350_v6  ;;  %1492 = vmatpush.msra.mxu3 %v1304_v2 }
 0x2d0   :  { %v1088_v57 = vand.u32 4294901760, %v1087_v56 }
 0x2d1   :  { %1393 = vmatpush.msra.mxu0 %v1356_v9  ;;  %1494 = vmatpush.msra.mxu3 %v1306_v8  ;;  %v1829_v9 = vld [vmem:[%s2408_s12] ss:$0 sm:$0xff]  ;;  %s1788_s12 = spop %1787 }
 0x2d2   :  { %1089 = vmatmul.f32.gmra.mxu0 %v1088_v57  ;;  %1264 = vmatmul.f32.vlgmr.msrb.gmra.mxu1 %v1076_v42  ;;  %s1790_s13 = spop %1789 }
 0x2d3   :  { %s1792_s23 = spop %1791 }
 0x2d4   :  { %s1794_s15 = spop %1793 }
 0x2d5   :  { %s1796_s25 = spop %1795 }
 0x2da   :  { %1235 = vmatmul.f32.vlgmr.msrb.gmra.mxu0 %v1076_v42  ;;  %1268 = vmatmul.f32.gmra.mxu1 %v1084_v52 }
 0x2e2   :  { %1239 = vmatmul.f32.gmra.mxu0 %v1084_v52 }
 0x33f   :  { %v1131_v17 = vpop.f32.mrf.mxu1 }
 0x347   :  { %v1082_v19 = vpop.f32.mrf.mxu0  ;;  %v1135_v22 = vpop.f32.mrf.mxu1 }
 0x348   :  { %v1083_v21 = vadd.f32 %v1827_v18, %v1082_v19  ;;  %v1165_v24 = vpop.f32.mrf.mxu2 }
 0x349   :  { %v1197_v28 = vpop.f32.mrf.mxu3 }
 0x34a   :  { %v1132_v7 = vadd.f32 %v1131_v17, %v1083_v21 }
 0x34c   :  { %v1166_v27 = vadd.f32 %v1165_v24, %v1132_v7 }
 0x34e   :  { %v1198_v29 = vadd.f32 %v1197_v28, %v1166_v27  ;;  %v1725_v27 = vld [vmem:[#allocation16 + $0x20] sm:$0xff] }
 0x34f   :  { %v1090_v26 = vpop.f32.mrf.mxu0  ;;  %v1265_v31 = vpop.f32.mrf.mxu1  ;;  %v1685_v28 = vld [vmem:[#allocation16] sm:$0xff] }
 0x350   :  { %v1091_v11 = vadd.f32 %v1827_v18, %v1090_v26  ;;  %v1170_v34 = vpop.f32.mrf.mxu2 }
 0x351   :  { %v1203_v38 = vpop.f32.mrf.mxu3 }
 0x352   :  { %v1136_v30 = vadd.f32 %v1135_v22, %v1091_v11  ;;  %v1705_v11 = vld [vmem:[#allocation16 + $0x10] sm:$0xff] }
 0x354   :  { %v1171_v35 = vadd.f32 %v1170_v34, %v1136_v30  ;;  %v1726_v30 = vld [vmem:[#allocation16 + $0x28] sm:$0xff] }
 0x355   :  { %v1686_v34 = vld [vmem:[#allocation16 + $0x8] sm:$0xff] }
 0x356   :  { %v1204_v39 = vadd.f32 %v1203_v38, %v1171_v35 }
 0x357   :  { %v1236_v32 = vpop.f32.mrf.mxu0  ;;  %v1269_v45 = vpop.f32.mrf.mxu1 }
 0x358   :  { %v1237_v33 = vadd.f32 %v1236_v32, %v1198_v29  ;;  %v1706_v32 = vld [vmem:[#allocation16 + $0x18] sm:$0xff] }
 0x35a   :  { %v1266_v36 = vadd.f32 %v1265_v31, %v1237_v33 }
 0x35c   :  { %v1272_v37 = vmax.f32 %v1266_v36, 0.0 }
 0x35e   :  { %v1283_v40 = vsel %vm613_vm1, %v1272_v37, 0 }
 0x35f   :  { %v1308_v41 = vand.u32 4294901760, %v1283_v40  ;;  %v1240_v42 = vpop.f32.mrf.mxu0 }
 0x360   :  { %v1241_v43 = vadd.f32 %v1240_v42, %v1204_v39 }
 0x361   :  { %v1309_v44 = vsub.f32 %v1283_v40, %v1308_v41  ;;  %1362 = vmatmul.f32.vlgmr.msrb.gmra.mxu3 %v1308_v41 }
 0x362   :  { %v1270_v46 = vadd.f32 %v1269_v45, %v1241_v43 }
 0x363   :  { %1396 = vmatmul.f32.vlgmr.msra.gmra.mxu0 %v1309_v44  ;;  %v1310_v47 = vand.u32 4294901760, %v1309_v44 }
 0x364   :  { %v1273_v48 = vmax.f32 %v1270_v46, 0.0  ;;  %v1746_v46 = vld [vmem:[#allocation16 + $0x38] sm:$0xff] }
 0x365   :  { %1428 = vmatmul.f32.vlgmr.msra.gmra.mxu1 %v1310_v47  ;;  %v1311_v49 = vsub.f32 %v1309_v44, %v1310_v47 }
 0x366   :  { %v1286_v50 = vsel %vm613_vm1, %v1273_v48, 0 }
 0x367   :  { %v1316_v51 = vand.u32 4294901760, %v1286_v50  ;;  %v1312_v52 = vand.u32 4294901760, %v1311_v49 }
 0x369   :  { %1313 = vmatmul.f32.vlgmr.msrb.gmra.mxu2 %v1312_v52  ;;  %1366 = vmatmul.f32.gmra.mxu3 %v1316_v51  ;;  %v1317_v53 = vsub.f32 %v1286_v50, %v1316_v51  ;;  %v1745_v50 = vld [vmem:[#allocation16 + $0x30] sm:$0xff] }
 0x36b   :  { %1401 = vmatmul.f32.gmra.mxu0 %v1317_v53  ;;  %v1318_v54 = vand.u32 4294901760, %v1317_v53 }
 0x36d   :  { %1434 = vmatmul.f32.gmra.mxu1 %v1318_v54  ;;  %v1319_v55 = vsub.f32 %v1317_v53, %v1318_v54 }
 0x36f   :  { %v1320_v56 = vand.u32 4294901760, %v1319_v55 }
 0x371   :  { %1321 = vmatmul.f32.gmra.mxu2 %v1320_v56  ;;  %1496 = vmatmul.f32.vlgmr.msra.gmra.mxu3 %v1308_v41 }
 0x379   :  { %1467 = vmatmul.f32.vlgmr.msra.gmra.mxu2 %v1308_v41  ;;  %1500 = vmatmul.f32.gmra.mxu3 %v1316_v51 }
 0x381   :  { %1471 = vmatmul.f32.gmra.mxu2 %v1316_v51 }
 0x3e0   :  { %v1397_v62 = vpop.f32.mrf.mxu0 }
 0x3e2   :  { %v1429_v3 = vpop.f32.mrf.mxu1 }
 0x3e4   :  { %v1363_v57 = vpop.f32.mrf.mxu3 }
 0x3e8   :  { %v1402_v16 = vpop.f32.mrf.mxu0 }
 0x3ea   :  { %v1435_v13 = vpop.f32.mrf.mxu1 }
 0x3ec   :  { %v1314_v1 = vpop.f32.mrf.mxu2  ;;  %v1367_v60 = vpop.f32.mrf.mxu3 }
 0x3ed   :  { %v1315_v59 = vadd.f32 %v1828_v58, %v1314_v1 }
 0x3ef   :  { %v1364_v61 = vadd.f32 %v1363_v57, %v1315_v59 }
 0x3f1   :  { %v1398_v2 = vadd.f32 %v1397_v62, %v1364_v61 }
 0x3f3   :  { %v1430_v5 = vadd.f32 %v1429_v3, %v1398_v2 }
 0x3f4   :  { %v1322_v0 = vpop.f32.mrf.mxu2  ;;  %v1497_v6 = vpop.f32.mrf.mxu3 }
 0x3f5   :  { %v1323_v63 = vadd.f32 %v1828_v58, %v1322_v0 }
 0x3f7   :  { %v1368_v4 = vadd.f32 %v1367_v60, %v1323_v63 }
 0x3f9   :  { %v1403_v10 = vadd.f32 %v1402_v16, %v1368_v4 }
 0x3fb   :  { %v1436_v20 = vadd.f32 %v1435_v13, %v1403_v10 }
 0x3fc   :  { %v1468_v8 = vpop.f32.mrf.mxu2  ;;  %v1501_v21 = vpop.f32.mrf.mxu3 }
 0x3fd   :  { %v1469_v12 = vadd.f32 %v1468_v8, %v1430_v5 }
 0x3ff   :  { %v1498_v23 = vadd.f32 %v1497_v6, %v1469_v12 }
 0x401   :  { %v1504_v25 = vmax.f32 %v1498_v23, 0.0 }
 0x403   :  { %v1510_v14 = vmul.f32 %v1829_v9, %v1504_v25 }
 0x404   :  { %v1472_v17 = vpop.f32.mrf.mxu2 }
 0x405   :  { %v1473_v18 = vadd.f32 %v1472_v17, %v1436_v20  ;;  %v1516_v19 = vadd.f32 %v1830_v15, %v1510_v14 }
 0x407   :  { %v1502_v22 = vadd.f32 %v1501_v21, %v1473_v18  ;;  %v1518_v24 = vmax.f32 %v1516_v19, 0.0  ;;  %v1520_v19 = vlaneseq }
 0x409   :  { %v1505_v7 = vmax.f32 %v1502_v22, 0.0  ;;  %v1727_v31 = vmul.f32 %v1725_v27, %v1518_v24  ;;  %v1707_v33 = vmul.f32 %v1705_v11, %v1518_v24  ;;  %v1687_v36 = vmul.f32 %v1685_v28, %v1518_v24 }
 0x40a   :  { %v1747_v52 = vmul.f32 %v1745_v50, %v1518_v24  ;;  %v1521_v21 = vand.u32 127, %v1520_v19  ;;  %v1540_v22 = vstv %s1788_s12  ;;  %v1582_v28 = vstv %s1792_s23 }
 0x40b   :  { %v1511_v26 = vmul.f32 %v1829_v9, %v1505_v7  ;;  %v1729_v40 = vsel %vm613_vm1, %v1727_v31, 0.0  ;;  %v1709_v41 = vsel %vm613_vm1, %v1707_v33, 0.0  ;;  %v1689_v44 = vsel %vm613_vm1, %v1687_v36, 0.0  ;;  %v1522_v7 = vld [vmem:[%s2413_s17] sm:$0x1]  ;;  %s1798_s17 = spop %1797 }
 0x40c   :  { %v1749_v54 = vsel %vm613_vm1, %v1747_v52, 0.0  ;;  %vm1539_vm2 = vcmp.eq.s32.totalorder %v1521_v21, 0  ;;  %vm1560_vm3 = vcmp.eq.s32.totalorder %v1521_v21, 1  ;;  %vm1581_vm4 = vcmp.eq.s32.totalorder %v1521_v21, 2  ;;  %s1800_s8 = spop %1799 }
 0x40d   :  { %v1517_v29 = vadd.f32 %v1830_v15, %v1511_v26  ;;  %v1541_v24 = vsel %vm1539_vm2, %v1540_v22, 0.0  ;;  %v1561_v26 = vstv %s1790_s13  ;;  %vm1602_vm5 = vcmp.eq.s32.totalorder %v1521_v21, 3  ;;  %s1802_s21 = spop %1801 }
 0x40e   :  { %v1542_v27 = vadd.f32 %v1541_v24, %v1522_v7  ;;  %v1562_v11 = vsel %vm1560_vm3, %v1561_v26, 0.0  ;;  %v1603_v31 = vstv %s1794_s15  ;;  %v1642_v36 = vstv %s1798_s17 }
 0x40f   :  { %v1519_v35 = vmax.f32 %v1517_v29, 0.0  ;;  %v1604_v33 = vsel %vm1602_vm5, %v1603_v31, 0.0 }
 0x410   :  { %v1563_v29 = vadd.f32 %v1562_v11, %v1542_v27 }
 0x411   :  { %v1728_v37 = vmul.f32 %v1726_v30, %v1519_v35  ;;  %v1708_v38 = vmul.f32 %v1706_v32, %v1519_v35  ;;  %v1688_v39 = vmul.f32 %v1686_v34, %v1519_v35  ;;  %v1748_v51 = vmul.f32 %v1746_v46, %v1519_v35 }
 0x412   :  { %v1583_v30 = vsel %vm1581_vm4, %v1582_v28, 0.0  ;;  %v1622_v34 = vstv %s1796_s25 }
 0x413   :  { %v1730_v42 = vsel %vm613_vm1, %v1728_v37, 0.0  ;;  %v1710_v43 = vsel %vm613_vm1, %v1708_v38, 0.0  ;;  %v1690_v45 = vsel %vm613_vm1, %v1688_v39, 0.0  ;;  %v1750_v53 = vsel %vm613_vm1, %v1748_v51, 0.0 }
 0x414   :  { %v1731_v47 = vadd.f32 %v1730_v42, %v1729_v40  ;;  %v1711_v48 = vadd.f32 %v1710_v43, %v1709_v41  ;;  %v1691_v49 = vadd.f32 %v1690_v45, %v1689_v44  ;;  %v1751_v55 = vadd.f32 %v1750_v53, %v1749_v54 }
 0x415   :  { %v1584_v32 = vadd.f32 %v1583_v30, %v1563_v29  ;;  %v1623_v37 = vsel %vm1539_vm2, %v1622_v34, 0.0  ;;  %v1643_v38 = vsel %vm1560_vm3, %v1642_v36, 0.0  ;;  %v1662_v41 = vstv %s1800_s8 }
 0x416   :  { %1732 = vadd.xlane.f32.xlu1 %v1731_v47  ;;  %1712 = vadd.xlane.f32.xlu0 %v1711_v48  ;;  %v1663_v42 = vsel %vm1581_vm4, %v1662_v41, 0.0  ;;  %v1682_v44 = vstv %s1802_s21 }
 0x417   :  { %1692 = vadd.xlane.f32.xlu2 %v1691_v49  ;;  %v1605_v35 = vadd.f32 %v1604_v33, %v1584_v32  ;;  %v1683_v45 = vsel %vm1602_vm5, %v1682_v44, 0.0 }
 0x419   :  { %v1624_v39 = vadd.f32 %v1623_v37, %v1605_v35 }
 0x41b   :  { %v1644_v40 = vadd.f32 %v1643_v38, %v1624_v39 }
 0x41d   :  { %v1664_v43 = vadd.f32 %v1663_v42, %v1644_v40 }
 0x41f   :  { %1752 = vadd.xlane.f32.xlu2 %v1751_v55  ;;  %v1684_v46 = vadd.f32 %v1683_v45, %v1664_v43 }
 0x489   :  { %v1733_v56 = vpop.xlane.xlu1 %1732  ;;  %v1713_v57 = vpop.xlane.xlu0 %1712 }
 0x48a   :  { %v1734_v58 = vrot.slane %v1733_v56, 4  ;;  %v1714_v1 = vrot.slane %v1713_v57, 4  ;;  %v1693_v59 = vpop.xlane.xlu2 %1692 }
 0x48b   :  { %v1694_v60 = vrot.slane %v1693_v59, 4 }
 0x48c   :  { %v1735_v61 = vadd.f32 %v1734_v58, %v1733_v56  ;;  %v1715_v62 = vadd.f32 %v1714_v1, %v1713_v57 }
 0x48d   :  { %v1695_v0 = vadd.f32 %v1694_v60, %v1693_v59 }
 0x48e   :  { %v1736_v63 = vrot.slane %v1735_v61, 2  ;;  %v1716_v2 = vrot.slane %v1715_v62, 2 }
 0x48f   :  { %v1696_v3 = vrot.slane %v1695_v0, 2 }
 0x490   :  { %v1737_v4 = vadd.f32 %v1736_v63, %v1735_v61  ;;  %v1717_v5 = vadd.f32 %v1716_v2, %v1715_v62 }
 0x491   :  { %v1697_v6 = vadd.f32 %v1696_v3, %v1695_v0 }
 0x492   :  { %v1753_v8 = vpop.xlane.xlu2 %1752  ;;  %v1718_v12 = vrot.slane %v1717_v5, 1  ;;  %v1738_v16 = vrot.slane %v1737_v4, 1 }
 0x493   :  { %v1754_v23 = vrot.slane %v1753_v8, 4  ;;  %v1698_v9 = vrot.slane %v1697_v6, 1 }
 0x494   :  { %v1719_v10 = vadd.f32 %v1718_v12, %v1717_v5  ;;  %v1739_v15 = vadd.f32 %v1738_v16, %v1737_v4 }
 0x495   :  { %v1755_v25 = vadd.f32 %v1754_v23, %v1753_v8  ;;  %v1699_v13 = vadd.f32 %v1698_v9, %v1697_v6 }
 0x497   :  { %v1756_v14 = vrot.slane %v1755_v25, 2  ;;  %1803 = vpush %v1699_v13 }
 0x498   :  { %1805 = vpush %v1719_v10 }
 0x499   :  { %v1757_v20 = vadd.f32 %v1756_v14, %v1755_v25  ;;  %1807 = vpush %v1739_v15 }
 0x49b   :  { %v1758_v17 = vrot.slane %v1757_v20, 1 }
 0x49d   :  { %v1759_v18 = vadd.f32 %v1758_v17, %v1757_v20 }
 0x49f   :  { %1809 = vpush %v1759_v18 }
 0x4c8   :  { %s1804_s24 = spop %1803 }
 0x4c9   :  { %v1701_v47 = vstv %s1804_s24  ;;  %s1806_s4 = spop %1805 }
 0x4ca   :  { %v1702_v48 = vsel %vm1539_vm2, %v1701_v47, 0.0  ;;  %v1721_v49 = vstv %s1806_s4  ;;  %s1808_s14 = spop %1807 }
 0x4cb   :  { %v1703_v50 = vadd.f32 %v1702_v48, %v1684_v46  ;;  %v1722_v51 = vsel %vm1560_vm3, %v1721_v49, 0.0  ;;  %v1741_v53 = vstv %s1808_s14 }
 0x4cc   :  { %v1742_v54 = vsel %vm1581_vm4, %v1741_v53, 0.0 }
 0x4cd   :  { %v1723_v52 = vadd.f32 %v1722_v51, %v1703_v50 }
 0x4cf   :  { %v1743_v55 = vadd.f32 %v1742_v54, %v1723_v52 }
 0x4d0   :  { %s1810_s3 = spop %1809 }
 0x4d1   :  { %v1761_v56 = vstv %s1810_s3 }
 0x4d2   :  { %v1762_v57 = vsel %vm1602_vm5, %v1761_v56, 0.0 }
 0x4d3   :  { %v1763_v58 = vadd.f32 %v1762_v57, %v1743_v55 }
 0x4d5   :  { %1765 = vst.msk [vmem:[#allocation17] sm:$0x1] %vm1764_vm6, %v1763_v58 }
 0x4d6   :  { %1776 = dma.vmem_to_hbm [thread:$0]  %s1772_s5, 16, %s1774_s22, [#allocation4]  }
 0x4d7   :  { %2081 = dma.done.wait [#allocation4], 16  }
 0x4d8   :  { %2082 = vsyncadd [#allocation4], 4294967280 }
 0x4d9   :  { %1781 = vsyncpa [#allocation3], 1 }
 0x4da   :  { %1782 = vsyncpa [#allocation6], 1 }
 0x4db   :  { %1783 = vsyncpa [#allocation9], 1 }
 0x4dc   :  { %1784 = vsyncpa [#allocation12], 1 }
 0x4dd   :  { %1785 = vsyncpa [#allocation15], 1 }
 0x4de   :  { %1786 = vsyncpa [#allocation4], 1 }

</bundles_post_ra>
